<compile_context>
chip_gen: v7x
topology: tpu7x:2x2x1
jax: 0.10.0
libtpu: 0.0.40
codegen_flags: <defaults>
</compile_context>

<pallas_src>
import math

import jax
import jax.numpy as jnp
from jax.experimental import pallas as pl
from jax.experimental.pallas import tpu as pltpu

EPS = 1e-5          # PyTorch BatchNorm default eps
K1_PAD = 32         # conv1 contracting dim 25 -> 32
K2_PAD = 160        # conv2 contracting dim 150 -> 160


def _vmem():
    return pl.BlockSpec(memory_space=pltpu.MemorySpace.VMEM)


# ---------------------------------------------------------------------------
# Pallas kernels
# ---------------------------------------------------------------------------
def _conv_bn_relu_pool_kernel(cols_ref, w_ref, b_ref, g_ref, beta_ref, o_ref):
    """Fused conv (4 quadrant matmuls) + bias + train-mode BN + ReLU + 2x2 maxpool.

    cols_ref : (4, K, M) bf16  im2col patches; quadrant q = 2*dh + dw of the pool window,
                               column m = n*Hp*Wp + h*Wp + w (pooled-output position).
    w_ref    : (C, K)   bf16  conv weights (pre-transposed, K zero-padded).
    b_ref, g_ref, beta_ref : (C, 1) f32  conv bias, BN gamma, BN beta.
    o_ref    : (C, M)   bf16  pooled activations.
    """
    w = w_ref[...]
    b = b_ref[...]
    # Conv for each pool-window quadrant: (C, K) @ (K, M) -> (C, M), f32 accumulation.
    y = [jnp.dot(w, cols_ref[q], preferred_element_type=jnp.float32) + b
         for q in range(4)]

    # Training-mode BatchNorm statistics over all 4*M conv-output positions (biased var).
    count = 4.0 * y[0].shape[1]
    mean = (y[0].sum(axis=1, keepdims=True) + y[1].sum(axis=1, keepdims=True)
            + y[2].sum(axis=1, keepdims=True) + y[3].sum(axis=1, keepdims=True)) / count
    var = (((y[0] - mean) ** 2).sum(axis=1, keepdims=True)
           + ((y[1] - mean) ** 2).sum(axis=1, keepdims=True)
           + ((y[2] - mean) ** 2).sum(axis=1, keepdims=True)
           + ((y[3] - mean) ** 2).sum(axis=1, keepdims=True)) / count
    scale = g_ref[...] * jax.lax.rsqrt(var + EPS)
    shift = beta_ref[...]

    z = [jnp.maximum((yq - mean) * scale + shift, 0.0) for yq in y]
    # MaxPool2d(2, 2): elementwise max over the 4 quadrants.
    pooled = jnp.maximum(jnp.maximum(z[0], z[1]), jnp.maximum(z[2], z[3]))
    o_ref[...] = pooled.astype(o_ref.dtype)


def _fc_stack_kernel(p_ref, w1_ref, fb1_ref, g3_ref, be3_ref,
                     w2_ref, fb2_ref, g4_ref, be4_ref,
                     w3_ref, fb3_ref, o_ref):
    """Fused fc1 + bn3 + relu + fc2 + bn4 + relu + fc3.

    p_ref  : (N, 256)   bf16  flattened pooled conv2 activations (PyTorch NCHW order).
    w*_ref : bf16 weight.T matrices; fb*/g*/be* : (1, F) f32 bias / BN gamma / BN beta.
    """
    def bn_relu(h, g, beta):
        m = jnp.mean(h, axis=0, keepdims=True)
        v = jnp.mean((h - m) ** 2, axis=0, keepdims=True)
        return jnp.maximum((h - m) * (g * jax.lax.rsqrt(v + EPS)) + beta, 0.0)

    h = jnp.dot(p_ref[...], w1_ref[...],
                preferred_element_type=jnp.float32) + fb1_ref[...]
    h = bn_relu(h, g3_ref[...], be3_ref[...])
    h = jnp.dot(h.astype(jnp.bfloat16), w2_ref[...],
                preferred_element_type=jnp.float32) + fb2_ref[...]
    h = bn_relu(h, g4_ref[...], be4_ref[...])
    o_ref[...] = jnp.dot(h.astype(jnp.bfloat16), w3_ref[...],
                         preferred_element_type=jnp.float32) + fb3_ref[...]


# ---------------------------------------------------------------------------
# pallas_call wrappers
# ---------------------------------------------------------------------------
def conv_block(cols, w, b, g, beta):
    C = w.shape[0]
    M = cols.shape[2]
    return pl.pallas_call(
        _conv_bn_relu_pool_kernel,
        out_shape=jax.ShapeDtypeStruct((C, M), jnp.bfloat16),
        in_specs=[_vmem()] * 5,
        out_specs=_vmem(),
    )(cols, w, b, g, beta)


def fc_stack(p_flat, prep):
    N = p_flat.shape[0]
    return pl.pallas_call(
        _fc_stack_kernel,
        out_shape=jax.ShapeDtypeStruct((N, 10), jnp.float32),
        in_specs=[_vmem()] * 11,
        out_specs=_vmem(),
    )(p_flat, prep["w1"], prep["fb1"], prep["g3"], prep["be3"],
      prep["w2"], prep["fb2"], prep["g4"], prep["be4"],
      prep["w3"], prep["fb3"])


# ---------------------------------------------------------------------------
# Glue: im2col with pool-quadrant column grouping (XLA, runs on tiny tensors)
# ---------------------------------------------------------------------------
def _im2col_pool_quadrants(x_nhwc, kh, kw):
    """x: (N, H, W, C).  Valid conv (kh, kw), stride 1, whose output grid is then
    2x2/2 max-pooled.  Returns cols of shape (4, kh*kw*C, N*Hp*Wp) with
      cols[2*dh+dw, (i*kw+j)*C + c, n*Hp*Wp + h*Wp + w] = x[n, 2h+dh+i, 2w+dw+j, c].
    """
    N, H, W, C = x_nhwc.shape
    Ho, Wo = H - kh + 1, W - kw + 1
    Hp, Wp = Ho // 2, Wo // 2
    patches = jnp.stack(
        [x_nhwc[:, i:i + Ho, j:j + Wo, :] for i in range(kh) for j in range(kw)],
        axis=3)                                      # (N, Ho, Wo, kh*kw, C)
    p = patches.reshape(N, Hp, 2, Wp, 2, kh * kw, C)  # split ho->(h,dh), wo->(w,dw)
    p = jnp.transpose(p, (2, 4, 5, 6, 0, 1, 3))       # (dh, dw, kh*kw, C, N, Hp, Wp)
    return p.reshape(4, kh * kw * C, N * Hp * Wp)


def _pad_axis(a, axis, to):
    pad = to - a.shape[axis]
    if pad <= 0:
        return a
    cfg = [(0, 0)] * a.ndim
    cfg[axis] = (0, pad)
    return jnp.pad(a, cfg)


# ---------------------------------------------------------------------------
# Parameters (deterministic, PyTorch-default-style uniform init) + prep
# ---------------------------------------------------------------------------
def init_params(key):
    def conv_init(k, cout, cin, ksz):
        bound = 1.0 / math.sqrt(cin * ksz * ksz)
        kw_, kb_ = jax.random.split(k)
        w = jax.random.uniform(kw_, (cout, cin, ksz, ksz), jnp.float32, -bound, bound)
        b = jax.random.uniform(kb_, (cout,), jnp.float32, -bound, bound)
        return w, b

    def lin_init(k, fin, fout):
        bound = 1.0 / math.sqrt(fin)
        kw_, kb_ = jax.random.split(k)
        w = jax.random.uniform(kw_, (fin, fout), jnp.float32, -bound, bound)  # weight.T
        b = jax.random.uniform(kb_, (fout,), jnp.float32, -bound, bound)
        return w, b

    ks = jax.random.split(key, 5)
    params = {
        "conv1": conv_init(ks[0], 6, 1, 5),
        "conv2": conv_init(ks[1], 16, 6, 5),
        "fc1": lin_init(ks[2], 16 * 4 * 4, 120),
        "fc2": lin_init(ks[3], 120, 84),
        "fc3": lin_init(ks[4], 84, 10),
    }
    for name, c in (("bn1", 6), ("bn2", 16), ("bn3", 120), ("bn4", 84)):
        params[name] = (jnp.ones((c,), jnp.float32), jnp.zeros((c,), jnp.float32))
    return params


def prepare_params(params):
    """One-time re-layout / padding / bf16 cast of weights into kernel-ready form."""
    w1, cb1 = params["conv1"]       # (6,1,5,5), (6,)
    w2, cb2 = params["conv2"]       # (16,6,5,5), (16,)
    g1, be1 = params["bn1"]
    g2, be2 = params["bn2"]
    g3, be3 = params["bn3"]
    g4, be4 = params["bn4"]
    wf1, fb1 = params["fc1"]        # (256,120), (120,)
    wf2, fb2 = params["fc2"]        # (120,84), (84,)
    wf3, fb3 = params["fc3"]        # (84,10), (10,)

    col = lambda v: v.reshape(-1, 1).astype(jnp.float32)
    row = lambda v: v.reshape(1, -1).astype(jnp.float32)

    # conv1: (6,1,5,5) -> (6, 25) -> zero-pad K to 32; k index = i*5 + j
    w1t = _pad_axis(w1.reshape(6, 25), 1, K1_PAD).astype(jnp.bfloat16)
    # conv2: (16,6,5,5) -> (16, i, j, ci) -> (16, 150) -> pad K to 160; k = (i*5+j)*6 + ci
    w2t = _pad_axis(jnp.transpose(w2, (0, 2, 3, 1)).reshape(16, 150),
                    1, K2_PAD).astype(jnp.bfloat16)
    return dict(
        w1t=w1t, cb1=col(cb1), g1=col(g1), be1=col(be1),
        w2t=w2t, cb2=col(cb2), g2=col(g2), be2=col(be2),
        w1=wf1.astype(jnp.bfloat16), fb1=row(fb1), g3=row(g3), be3=row(be3),
        w2=wf2.astype(jnp.bfloat16), fb2=row(fb2), g4=row(g4), be4=row(be4),
        w3=wf3.astype(jnp.bfloat16), fb3=row(fb3),
    )


# ---------------------------------------------------------------------------
# Forward pass (matches Net.forward semantics, BatchNorm in training mode)
# ---------------------------------------------------------------------------
def net_forward(prep, x_nchw):
    N = x_nchw.shape[0]
    x = jnp.transpose(x_nchw, (0, 2, 3, 1)).astype(jnp.bfloat16)      # (N, 28, 28, 1)

    # block 1: conv1 -> bn1 -> relu -> pool   (single fused pallas_call)
    cols1 = _pad_axis(_im2col_pool_quadrants(x, 5, 5), 1, K1_PAD)     # (4, 32, N*144)
    p1 = conv_block(cols1, prep["w1t"], prep["cb1"], prep["g1"], prep["be1"])  # (6, N*144)

    # block 2: conv2 -> bn2 -> relu -> pool   (single fused pallas_call)
    p1_nhwc = jnp.transpose(p1.reshape(6, N, 12, 12), (1, 2, 3, 0))   # (N, 12, 12, 6)
    cols2 = _pad_axis(_im2col_pool_quadrants(p1_nhwc, 5, 5), 1, K2_PAD)  # (4, 160, N*16)
    p2 = conv_block(cols2, prep["w2t"], prep["cb2"], prep["g2"], prep["be2"])  # (16, N*16)

    # NCHW flatten: (16, N, 16)[c, n, s] -> (N, 256) with column = c*16 + s (PyTorch order).
    p2_flat = jnp.transpose(p2.reshape(16, N, 16), (1, 0, 2)).reshape(N, 256)

    # FC stack: fc1 -> bn3 -> relu -> fc2 -> bn4 -> relu -> fc3  (single fused pallas_call)
    return fc_stack(p2_flat, prep)   # (N, 10) f32


if __name__ == "__main__":
    key = jax.random.PRNGKey(0)
    kparams, kx = jax.random.split(key)
    params = init_params(kparams)
    prep = prepare_params(params)

    # LeNet geometry implies 28x28 single-channel input; small batch of 2.
    x = jax.random.normal(kx, (2, 1, 28, 28), dtype=jnp.float32)

    fwd = jax.jit(net_forward)
    out = fwd(prep, x)
    jax.block_until_ready(out)
    assert out.shape == (2, 10) and out.dtype == jnp.float32
    print("KERNEL_OK")
</pallas_src>

<mosaic_0001>
module attributes {stable_mosaic.version = 11 : i64} {
  func.func @_conv_bn_relu_pool_kernel(%arg0: memref<4x32x288xbf16, #tpu.memory_space<vmem>>, %arg1: memref<6x32xbf16, #tpu.memory_space<vmem>>, %arg2: memref<6x1xf32, #tpu.memory_space<vmem>>, %arg3: memref<6x1xf32, #tpu.memory_space<vmem>>, %arg4: memref<6x1xf32, #tpu.memory_space<vmem>>, %arg5: memref<6x288xbf16, #tpu.memory_space<vmem>>) attributes {dimension_semantics = [], scalar_prefetch = 0 : i64, scratch_operands = 0 : i64, tpu.core_type = #tpu.core_type<tc>} {
    %c0 = arith.constant 0 : index
    %c0_0 = arith.constant 0 : index
    %0 = vector.load %arg1[%c0, %c0_0] : memref<6x32xbf16, #tpu.memory_space<vmem>>, vector<6x32xbf16>
    %c0_1 = arith.constant 0 : index
    %c0_2 = arith.constant 0 : index
    %1 = vector.load %arg2[%c0_1, %c0_2] : memref<6x1xf32, #tpu.memory_space<vmem>>, vector<6x1xf32>
    %c0_3 = arith.constant 0 : index
    %c0_4 = arith.constant 0 : index
    %c0_5 = arith.constant 0 : index
    %2 = vector.load %arg0[%c0_3, %c0_4, %c0_5] : memref<4x32x288xbf16, #tpu.memory_space<vmem>>, vector<1x32x288xbf16>
    %3 = vector.shape_cast %2 : vector<1x32x288xbf16> to vector<32x288xbf16>
    %cst = arith.constant dense<0.000000e+00> : vector<6x288xf32>
    %4 = tpu.matmul %0, %3, %cst {dimension_numbers = #tpu.dot_dimension_numbers<[1], [0], [0], [1], [0, 0, 1, 1], [], []>} : vector<6x32xbf16>, vector<32x288xbf16>, vector<6x288xf32> -> vector<6x288xf32>
    %5 = vector.broadcast %1 : vector<6x1xf32> to vector<6x288xf32>
    %6 = arith.addf %4, %5 : vector<6x288xf32>
    %c1 = arith.constant 1 : index
    %c0_6 = arith.constant 0 : index
    %c0_7 = arith.constant 0 : index
    %7 = vector.load %arg0[%c1, %c0_6, %c0_7] : memref<4x32x288xbf16, #tpu.memory_space<vmem>>, vector<1x32x288xbf16>
    %8 = vector.shape_cast %7 : vector<1x32x288xbf16> to vector<32x288xbf16>
    %cst_8 = arith.constant dense<0.000000e+00> : vector<6x288xf32>
    %9 = tpu.matmul %0, %8, %cst_8 {dimension_numbers = #tpu.dot_dimension_numbers<[1], [0], [0], [1], [0, 0, 1, 1], [], []>} : vector<6x32xbf16>, vector<32x288xbf16>, vector<6x288xf32> -> vector<6x288xf32>
    %10 = vector.broadcast %1 : vector<6x1xf32> to vector<6x288xf32>
    %11 = arith.addf %9, %10 : vector<6x288xf32>
    %c2 = arith.constant 2 : index
    %c0_9 = arith.constant 0 : index
    %c0_10 = arith.constant 0 : index
    %12 = vector.load %arg0[%c2, %c0_9, %c0_10] : memref<4x32x288xbf16, #tpu.memory_space<vmem>>, vector<1x32x288xbf16>
    %13 = vector.shape_cast %12 : vector<1x32x288xbf16> to vector<32x288xbf16>
    %cst_11 = arith.constant dense<0.000000e+00> : vector<6x288xf32>
    %14 = tpu.matmul %0, %13, %cst_11 {dimension_numbers = #tpu.dot_dimension_numbers<[1], [0], [0], [1], [0, 0, 1, 1], [], []>} : vector<6x32xbf16>, vector<32x288xbf16>, vector<6x288xf32> -> vector<6x288xf32>
    %15 = vector.broadcast %1 : vector<6x1xf32> to vector<6x288xf32>
    %16 = arith.addf %14, %15 : vector<6x288xf32>
    %c3 = arith.constant 3 : index
    %c0_12 = arith.constant 0 : index
    %c0_13 = arith.constant 0 : index
    %17 = vector.load %arg0[%c3, %c0_12, %c0_13] : memref<4x32x288xbf16, #tpu.memory_space<vmem>>, vector<1x32x288xbf16>
    %18 = vector.shape_cast %17 : vector<1x32x288xbf16> to vector<32x288xbf16>
    %cst_14 = arith.constant dense<0.000000e+00> : vector<6x288xf32>
    %19 = tpu.matmul %0, %18, %cst_14 {dimension_numbers = #tpu.dot_dimension_numbers<[1], [0], [0], [1], [0, 0, 1, 1], [], []>} : vector<6x32xbf16>, vector<32x288xbf16>, vector<6x288xf32> -> vector<6x288xf32>
    %20 = vector.broadcast %1 : vector<6x1xf32> to vector<6x288xf32>
    %21 = arith.addf %19, %20 : vector<6x288xf32>
    %cst_15 = arith.constant dense<0.000000e+00> : vector<6xf32>
    %22 = vector.multi_reduction <add>, %6, %cst_15 [1] : vector<6x288xf32> to vector<6xf32>
    %23 = vector.shape_cast %22 : vector<6xf32> to vector<6x1xf32>
    %cst_16 = arith.constant dense<0.000000e+00> : vector<6xf32>
    %24 = vector.multi_reduction <add>, %11, %cst_16 [1] : vector<6x288xf32> to vector<6xf32>
    %25 = vector.shape_cast %24 : vector<6xf32> to vector<6x1xf32>
    %26 = arith.addf %23, %25 : vector<6x1xf32>
    %cst_17 = arith.constant dense<0.000000e+00> : vector<6xf32>
    %27 = vector.multi_reduction <add>, %16, %cst_17 [1] : vector<6x288xf32> to vector<6xf32>
    %28 = vector.shape_cast %27 : vector<6xf32> to vector<6x1xf32>
    %29 = arith.addf %26, %28 : vector<6x1xf32>
    %cst_18 = arith.constant dense<0.000000e+00> : vector<6xf32>
    %30 = vector.multi_reduction <add>, %21, %cst_18 [1] : vector<6x288xf32> to vector<6xf32>
    %31 = vector.shape_cast %30 : vector<6xf32> to vector<6x1xf32>
    %32 = arith.addf %29, %31 : vector<6x1xf32>
    %cst_19 = arith.constant 1.152000e+03 : f32
    %33 = vector.broadcast %cst_19 : f32 to vector<6x1xf32>
    %34 = arith.divf %32, %33 : vector<6x1xf32>
    %35 = vector.broadcast %34 : vector<6x1xf32> to vector<6x288xf32>
    %36 = arith.subf %6, %35 : vector<6x288xf32>
    %37 = arith.mulf %36, %36 : vector<6x288xf32>
    %cst_20 = arith.constant dense<0.000000e+00> : vector<6xf32>
    %38 = vector.multi_reduction <add>, %37, %cst_20 [1] : vector<6x288xf32> to vector<6xf32>
    %39 = vector.shape_cast %38 : vector<6xf32> to vector<6x1xf32>
    %40 = vector.broadcast %34 : vector<6x1xf32> to vector<6x288xf32>
    %41 = arith.subf %11, %40 : vector<6x288xf32>
    %42 = arith.mulf %41, %41 : vector<6x288xf32>
    %cst_21 = arith.constant dense<0.000000e+00> : vector<6xf32>
    %43 = vector.multi_reduction <add>, %42, %cst_21 [1] : vector<6x288xf32> to vector<6xf32>
    %44 = vector.shape_cast %43 : vector<6xf32> to vector<6x1xf32>
    %45 = arith.addf %39, %44 : vector<6x1xf32>
    %46 = vector.broadcast %34 : vector<6x1xf32> to vector<6x288xf32>
    %47 = arith.subf %16, %46 : vector<6x288xf32>
    %48 = arith.mulf %47, %47 : vector<6x288xf32>
    %cst_22 = arith.constant dense<0.000000e+00> : vector<6xf32>
    %49 = vector.multi_reduction <add>, %48, %cst_22 [1] : vector<6x288xf32> to vector<6xf32>
    %50 = vector.shape_cast %49 : vector<6xf32> to vector<6x1xf32>
    %51 = arith.addf %45, %50 : vector<6x1xf32>
    %52 = vector.broadcast %34 : vector<6x1xf32> to vector<6x288xf32>
    %53 = arith.subf %21, %52 : vector<6x288xf32>
    %54 = arith.mulf %53, %53 : vector<6x288xf32>
    %cst_23 = arith.constant dense<0.000000e+00> : vector<6xf32>
    %55 = vector.multi_reduction <add>, %54, %cst_23 [1] : vector<6x288xf32> to vector<6xf32>
    %56 = vector.shape_cast %55 : vector<6xf32> to vector<6x1xf32>
    %57 = arith.addf %51, %56 : vector<6x1xf32>
    %cst_24 = arith.constant 1.152000e+03 : f32
    %58 = vector.broadcast %cst_24 : f32 to vector<6x1xf32>
    %59 = arith.divf %57, %58 : vector<6x1xf32>
    %c0_25 = arith.constant 0 : index
    %c0_26 = arith.constant 0 : index
    %60 = vector.load %arg3[%c0_25, %c0_26] : memref<6x1xf32, #tpu.memory_space<vmem>>, vector<6x1xf32>
    %cst_27 = arith.constant 9.99999974E-6 : f32
    %61 = vector.broadcast %cst_27 : f32 to vector<6x1xf32>
    %62 = arith.addf %59, %61 : vector<6x1xf32>
    %63 = math.rsqrt %62 : vector<6x1xf32>
    %64 = arith.mulf %60, %63 : vector<6x1xf32>
    %c0_28 = arith.constant 0 : index
    %c0_29 = arith.constant 0 : index
    %65 = vector.load %arg4[%c0_28, %c0_29] : memref<6x1xf32, #tpu.memory_space<vmem>>, vector<6x1xf32>
    %66 = vector.broadcast %34 : vector<6x1xf32> to vector<6x288xf32>
    %67 = arith.subf %6, %66 : vector<6x288xf32>
    %68 = vector.broadcast %64 : vector<6x1xf32> to vector<6x288xf32>
    %69 = arith.mulf %67, %68 : vector<6x288xf32>
    %70 = vector.broadcast %65 : vector<6x1xf32> to vector<6x288xf32>
    %71 = arith.addf %69, %70 : vector<6x288xf32>
    %cst_30 = arith.constant 0.000000e+00 : f32
    %72 = vector.broadcast %cst_30 : f32 to vector<6x288xf32>
    %73 = arith.maximumf %71, %72 : vector<6x288xf32>
    %74 = vector.broadcast %34 : vector<6x1xf32> to vector<6x288xf32>
    %75 = arith.subf %11, %74 : vector<6x288xf32>
    %76 = vector.broadcast %64 : vector<6x1xf32> to vector<6x288xf32>
    %77 = arith.mulf %75, %76 : vector<6x288xf32>
    %78 = vector.broadcast %65 : vector<6x1xf32> to vector<6x288xf32>
    %79 = arith.addf %77, %78 : vector<6x288xf32>
    %cst_31 = arith.constant 0.000000e+00 : f32
    %80 = vector.broadcast %cst_31 : f32 to vector<6x288xf32>
    %81 = arith.maximumf %79, %80 : vector<6x288xf32>
    %82 = vector.broadcast %34 : vector<6x1xf32> to vector<6x288xf32>
    %83 = arith.subf %16, %82 : vector<6x288xf32>
    %84 = vector.broadcast %64 : vector<6x1xf32> to vector<6x288xf32>
    %85 = arith.mulf %83, %84 : vector<6x288xf32>
    %86 = vector.broadcast %65 : vector<6x1xf32> to vector<6x288xf32>
    %87 = arith.addf %85, %86 : vector<6x288xf32>
    %cst_32 = arith.constant 0.000000e+00 : f32
    %88 = vector.broadcast %cst_32 : f32 to vector<6x288xf32>
    %89 = arith.maximumf %87, %88 : vector<6x288xf32>
    %90 = vector.broadcast %34 : vector<6x1xf32> to vector<6x288xf32>
    %91 = arith.subf %21, %90 : vector<6x288xf32>
    %92 = vector.broadcast %64 : vector<6x1xf32> to vector<6x288xf32>
    %93 = arith.mulf %91, %92 : vector<6x288xf32>
    %94 = vector.broadcast %65 : vector<6x1xf32> to vector<6x288xf32>
    %95 = arith.addf %93, %94 : vector<6x288xf32>
    %cst_33 = arith.constant 0.000000e+00 : f32
    %96 = vector.broadcast %cst_33 : f32 to vector<6x288xf32>
    %97 = arith.maximumf %95, %96 : vector<6x288xf32>
    %98 = arith.maximumf %73, %81 : vector<6x288xf32>
    %99 = arith.maximumf %89, %97 : vector<6x288xf32>
    %100 = arith.maximumf %98, %99 : vector<6x288xf32>
    %101 = arith.truncf %100 : vector<6x288xf32> to vector<6x288xbf16>
    %c0_34 = arith.constant 0 : index
    %c0_35 = arith.constant 0 : index
    %102 = vector.load %arg5[%c0_34, %c0_35] : memref<6x288xbf16, #tpu.memory_space<vmem>>, vector<6x288xbf16>
    tpu.vector_store %arg5[%c0_34, %c0_35], %101 {strides = array<i32>} : memref<6x288xbf16, #tpu.memory_space<vmem>>, vector<6x288xbf16>,
    return
  }
}

module attributes {stable_mosaic.version = 11 : i64} {
  func.func @_conv_bn_relu_pool_kernel(%arg0: memref<4x160x32xbf16, #tpu.memory_space<vmem>>, %arg1: memref<16x160xbf16, #tpu.memory_space<vmem>>, %arg2: memref<16x1xf32, #tpu.memory_space<vmem>>, %arg3: memref<16x1xf32, #tpu.memory_space<vmem>>, %arg4: memref<16x1xf32, #tpu.memory_space<vmem>>, %arg5: memref<16x32xbf16, #tpu.memory_space<vmem>>) attributes {dimension_semantics = [], scalar_prefetch = 0 : i64, scratch_operands = 0 : i64, tpu.core_type = #tpu.core_type<tc>} {
    %c0 = arith.constant 0 : index
    %c0_0 = arith.constant 0 : index
    %0 = vector.load %arg1[%c0, %c0_0] : memref<16x160xbf16, #tpu.memory_space<vmem>>, vector<16x160xbf16>
    %c0_1 = arith.constant 0 : index
    %c0_2 = arith.constant 0 : index
    %1 = vector.load %arg2[%c0_1, %c0_2] : memref<16x1xf32, #tpu.memory_space<vmem>>, vector<16x1xf32>
    %c0_3 = arith.constant 0 : index
    %c0_4 = arith.constant 0 : index
    %c0_5 = arith.constant 0 : index
    %2 = vector.load %arg0[%c0_3, %c0_4, %c0_5] : memref<4x160x32xbf16, #tpu.memory_space<vmem>>, vector<1x160x32xbf16>
    %3 = vector.shape_cast %2 : vector<1x160x32xbf16> to vector<160x32xbf16>
    %cst = arith.constant dense<0.000000e+00> : vector<16x32xf32>
    %4 = tpu.matmul %0, %3, %cst {dimension_numbers = #tpu.dot_dimension_numbers<[1], [0], [0], [1], [0, 0, 1, 1], [], []>} : vector<16x160xbf16>, vector<160x32xbf16>, vector<16x32xf32> -> vector<16x32xf32>
    %5 = vector.broadcast %1 : vector<16x1xf32> to vector<16x32xf32>
    %6 = arith.addf %4, %5 : vector<16x32xf32>
    %c1 = arith.constant 1 : index
    %c0_6 = arith.constant 0 : index
    %c0_7 = arith.constant 0 : index
    %7 = vector.load %arg0[%c1, %c0_6, %c0_7] : memref<4x160x32xbf16, #tpu.memory_space<vmem>>, vector<1x160x32xbf16>
    %8 = vector.shape_cast %7 : vector<1x160x32xbf16> to vector<160x32xbf16>
    %cst_8 = arith.constant dense<0.000000e+00> : vector<16x32xf32>
    %9 = tpu.matmul %0, %8, %cst_8 {dimension_numbers = #tpu.dot_dimension_numbers<[1], [0], [0], [1], [0, 0, 1, 1], [], []>} : vector<16x160xbf16>, vector<160x32xbf16>, vector<16x32xf32> -> vector<16x32xf32>
    %10 = vector.broadcast %1 : vector<16x1xf32> to vector<16x32xf32>
    %11 = arith.addf %9, %10 : vector<16x32xf32>
    %c2 = arith.constant 2 : index
    %c0_9 = arith.constant 0 : index
    %c0_10 = arith.constant 0 : index
    %12 = vector.load %arg0[%c2, %c0_9, %c0_10] : memref<4x160x32xbf16, #tpu.memory_space<vmem>>, vector<1x160x32xbf16>
    %13 = vector.shape_cast %12 : vector<1x160x32xbf16> to vector<160x32xbf16>
    %cst_11 = arith.constant dense<0.000000e+00> : vector<16x32xf32>
    %14 = tpu.matmul %0, %13, %cst_11 {dimension_numbers = #tpu.dot_dimension_numbers<[1], [0], [0], [1], [0, 0, 1, 1], [], []>} : vector<16x160xbf16>, vector<160x32xbf16>, vector<16x32xf32> -> vector<16x32xf32>
    %15 = vector.broadcast %1 : vector<16x1xf32> to vector<16x32xf32>
    %16 = arith.addf %14, %15 : vector<16x32xf32>
    %c3 = arith.constant 3 : index
    %c0_12 = arith.constant 0 : index
    %c0_13 = arith.constant 0 : index
    %17 = vector.load %arg0[%c3, %c0_12, %c0_13] : memref<4x160x32xbf16, #tpu.memory_space<vmem>>, vector<1x160x32xbf16>
    %18 = vector.shape_cast %17 : vector<1x160x32xbf16> to vector<160x32xbf16>
    %cst_14 = arith.constant dense<0.000000e+00> : vector<16x32xf32>
    %19 = tpu.matmul %0, %18, %cst_14 {dimension_numbers = #tpu.dot_dimension_numbers<[1], [0], [0], [1], [0, 0, 1, 1], [], []>} : vector<16x160xbf16>, vector<160x32xbf16>, vector<16x32xf32> -> vector<16x32xf32>
    %20 = vector.broadcast %1 : vector<16x1xf32> to vector<16x32xf32>
    %21 = arith.addf %19, %20 : vector<16x32xf32>
    %cst_15 = arith.constant dense<0.000000e+00> : vector<16xf32>
    %22 = vector.multi_reduction <add>, %6, %cst_15 [1] : vector<16x32xf32> to vector<16xf32>
    %23 = vector.shape_cast %22 : vector<16xf32> to vector<16x1xf32>
    %cst_16 = arith.constant dense<0.000000e+00> : vector<16xf32>
    %24 = vector.multi_reduction <add>, %11, %cst_16 [1] : vector<16x32xf32> to vector<16xf32>
    %25 = vector.shape_cast %24 : vector<16xf32> to vector<16x1xf32>
    %26 = arith.addf %23, %25 : vector<16x1xf32>
    %cst_17 = arith.constant dense<0.000000e+00> : vector<16xf32>
    %27 = vector.multi_reduction <add>, %16, %cst_17 [1] : vector<16x32xf32> to vector<16xf32>
    %28 = vector.shape_cast %27 : vector<16xf32> to vector<16x1xf32>
    %29 = arith.addf %26, %28 : vector<16x1xf32>
    %cst_18 = arith.constant dense<0.000000e+00> : vector<16xf32>
    %30 = vector.multi_reduction <add>, %21, %cst_18 [1] : vector<16x32xf32> to vector<16xf32>
    %31 = vector.shape_cast %30 : vector<16xf32> to vector<16x1xf32>
    %32 = arith.addf %29, %31 : vector<16x1xf32>
    %cst_19 = arith.constant 1.280000e+02 : f32
    %33 = vector.broadcast %cst_19 : f32 to vector<16x1xf32>
    %34 = arith.divf %32, %33 : vector<16x1xf32>
    %35 = vector.broadcast %34 : vector<16x1xf32> to vector<16x32xf32>
    %36 = arith.subf %6, %35 : vector<16x32xf32>
    %37 = arith.mulf %36, %36 : vector<16x32xf32>
    %cst_20 = arith.constant dense<0.000000e+00> : vector<16xf32>
    %38 = vector.multi_reduction <add>, %37, %cst_20 [1] : vector<16x32xf32> to vector<16xf32>
    %39 = vector.shape_cast %38 : vector<16xf32> to vector<16x1xf32>
    %40 = vector.broadcast %34 : vector<16x1xf32> to vector<16x32xf32>
    %41 = arith.subf %11, %40 : vector<16x32xf32>
    %42 = arith.mulf %41, %41 : vector<16x32xf32>
    %cst_21 = arith.constant dense<0.000000e+00> : vector<16xf32>
    %43 = vector.multi_reduction <add>, %42, %cst_21 [1] : vector<16x32xf32> to vector<16xf32>
    %44 = vector.shape_cast %43 : vector<16xf32> to vector<16x1xf32>
    %45 = arith.addf %39, %44 : vector<16x1xf32>
    %46 = vector.broadcast %34 : vector<16x1xf32> to vector<16x32xf32>
    %47 = arith.subf %16, %46 : vector<16x32xf32>
    %48 = arith.mulf %47, %47 : vector<16x32xf32>
    %cst_22 = arith.constant dense<0.000000e+00> : vector<16xf32>
    %49 = vector.multi_reduction <add>, %48, %cst_22 [1] : vector<16x32xf32> to vector<16xf32>
    %50 = vector.shape_cast %49 : vector<16xf32> to vector<16x1xf32>
    %51 = arith.addf %45, %50 : vector<16x1xf32>
    %52 = vector.broadcast %34 : vector<16x1xf32> to vector<16x32xf32>
    %53 = arith.subf %21, %52 : vector<16x32xf32>
    %54 = arith.mulf %53, %53 : vector<16x32xf32>
    %cst_23 = arith.constant dense<0.000000e+00> : vector<16xf32>
    %55 = vector.multi_reduction <add>, %54, %cst_23 [1] : vector<16x32xf32> to vector<16xf32>
    %56 = vector.shape_cast %55 : vector<16xf32> to vector<16x1xf32>
    %57 = arith.addf %51, %56 : vector<16x1xf32>
    %cst_24 = arith.constant 1.280000e+02 : f32
    %58 = vector.broadcast %cst_24 : f32 to vector<16x1xf32>
    %59 = arith.divf %57, %58 : vector<16x1xf32>
    %c0_25 = arith.constant 0 : index
    %c0_26 = arith.constant 0 : index
    %60 = vector.load %arg3[%c0_25, %c0_26] : memref<16x1xf32, #tpu.memory_space<vmem>>, vector<16x1xf32>
    %cst_27 = arith.constant 9.99999974E-6 : f32
    %61 = vector.broadcast %cst_27 : f32 to vector<16x1xf32>
    %62 = arith.addf %59, %61 : vector<16x1xf32>
    %63 = math.rsqrt %62 : vector<16x1xf32>
    %64 = arith.mulf %60, %63 : vector<16x1xf32>
    %c0_28 = arith.constant 0 : index
    %c0_29 = arith.constant 0 : index
    %65 = vector.load %arg4[%c0_28, %c0_29] : memref<16x1xf32, #tpu.memory_space<vmem>>, vector<16x1xf32>
    %66 = vector.broadcast %34 : vector<16x1xf32> to vector<16x32xf32>
    %67 = arith.subf %6, %66 : vector<16x32xf32>
    %68 = vector.broadcast %64 : vector<16x1xf32> to vector<16x32xf32>
    %69 = arith.mulf %67, %68 : vector<16x32xf32>
    %70 = vector.broadcast %65 : vector<16x1xf32> to vector<16x32xf32>
    %71 = arith.addf %69, %70 : vector<16x32xf32>
    %cst_30 = arith.constant 0.000000e+00 : f32
    %72 = vector.broadcast %cst_30 : f32 to vector<16x32xf32>
    %73 = arith.maximumf %71, %72 : vector<16x32xf32>
    %74 = vector.broadcast %34 : vector<16x1xf32> to vector<16x32xf32>
    %75 = arith.subf %11, %74 : vector<16x32xf32>
    %76 = vector.broadcast %64 : vector<16x1xf32> to vector<16x32xf32>
    %77 = arith.mulf %75, %76 : vector<16x32xf32>
    %78 = vector.broadcast %65 : vector<16x1xf32> to vector<16x32xf32>
    %79 = arith.addf %77, %78 : vector<16x32xf32>
    %cst_31 = arith.constant 0.000000e+00 : f32
    %80 = vector.broadcast %cst_31 : f32 to vector<16x32xf32>
    %81 = arith.maximumf %79, %80 : vector<16x32xf32>
    %82 = vector.broadcast %34 : vector<16x1xf32> to vector<16x32xf32>
    %83 = arith.subf %16, %82 : vector<16x32xf32>
    %84 = vector.broadcast %64 : vector<16x1xf32> to vector<16x32xf32>
    %85 = arith.mulf %83, %84 : vector<16x32xf32>
    %86 = vector.broadcast %65 : vector<16x1xf32> to vector<16x32xf32>
    %87 = arith.addf %85, %86 : vector<16x32xf32>
    %cst_32 = arith.constant 0.000000e+00 : f32
    %88 = vector.broadcast %cst_32 : f32 to vector<16x32xf32>
    %89 = arith.maximumf %87, %88 : vector<16x32xf32>
    %90 = vector.broadcast %34 : vector<16x1xf32> to vector<16x32xf32>
    %91 = arith.subf %21, %90 : vector<16x32xf32>
    %92 = vector.broadcast %64 : vector<16x1xf32> to vector<16x32xf32>
    %93 = arith.mulf %91, %92 : vector<16x32xf32>
    %94 = vector.broadcast %65 : vector<16x1xf32> to vector<16x32xf32>
    %95 = arith.addf %93, %94 : vector<16x32xf32>
    %cst_33 = arith.constant 0.000000e+00 : f32
    %96 = vector.broadcast %cst_33 : f32 to vector<16x32xf32>
    %97 = arith.maximumf %95, %96 : vector<16x32xf32>
    %98 = arith.maximumf %73, %81 : vector<16x32xf32>
    %99 = arith.maximumf %89, %97 : vector<16x32xf32>
    %100 = arith.maximumf %98, %99 : vector<16x32xf32>
    %101 = arith.truncf %100 : vector<16x32xf32> to vector<16x32xbf16>
    %c0_34 = arith.constant 0 : index
    %c0_35 = arith.constant 0 : index
    %102 = vector.load %arg5[%c0_34, %c0_35] : memref<16x32xbf16, #tpu.memory_space<vmem>>, vector<16x32xbf16>
    tpu.vector_store %arg5[%c0_34, %c0_35], %101 {strides = array<i32>} : memref<16x32xbf16, #tpu.memory_space<vmem>>, vector<16x32xbf16>,
    return
  }
}

module attributes {stable_mosaic.version = 11 : i64} {
  func.func @_fc_stack_kernel(%arg0: memref<2x256xbf16, #tpu.memory_space<vmem>>, %arg1: memref<256x120xbf16, #tpu.memory_space<vmem>>, %arg2: memref<1x120xf32, #tpu.memory_space<vmem>>, %arg3: memref<1x120xf32, #tpu.memory_space<vmem>>, %arg4: memref<1x120xf32, #tpu.memory_space<vmem>>, %arg5: memref<120x84xbf16, #tpu.memory_space<vmem>>, %arg6: memref<1x84xf32, #tpu.memory_space<vmem>>, %arg7: memref<1x84xf32, #tpu.memory_space<vmem>>, %arg8: memref<1x84xf32, #tpu.memory_space<vmem>>, %arg9: memref<84x10xbf16, #tpu.memory_space<vmem>>, %arg10: memref<1x10xf32, #tpu.memory_space<vmem>>, %arg11: memref<2x10xf32, #tpu.memory_space<vmem>>) attributes {dimension_semantics = [], scalar_prefetch = 0 : i64, scratch_operands = 0 : i64, tpu.core_type = #tpu.core_type<tc>} {
    %c0 = arith.constant 0 : index
    %c0_0 = arith.constant 0 : index
    %0 = vector.load %arg0[%c0, %c0_0] : memref<2x256xbf16, #tpu.memory_space<vmem>>, vector<2x256xbf16>
    %c0_1 = arith.constant 0 : index
    %c0_2 = arith.constant 0 : index
    %1 = vector.load %arg1[%c0_1, %c0_2] : memref<256x120xbf16, #tpu.memory_space<vmem>>, vector<256x120xbf16>
    %cst = arith.constant dense<0.000000e+00> : vector<2x120xf32>
    %2 = tpu.matmul %0, %1, %cst {dimension_numbers = #tpu.dot_dimension_numbers<[1], [0], [0], [1], [0, 0, 1, 1], [], []>} : vector<2x256xbf16>, vector<256x120xbf16>, vector<2x120xf32> -> vector<2x120xf32>
    %c0_3 = arith.constant 0 : index
    %c0_4 = arith.constant 0 : index
    %3 = vector.load %arg2[%c0_3, %c0_4] : memref<1x120xf32, #tpu.memory_space<vmem>>, vector<1x120xf32>
    %4 = vector.broadcast %3 : vector<1x120xf32> to vector<2x120xf32>
    %5 = arith.addf %2, %4 : vector<2x120xf32>
    %c0_5 = arith.constant 0 : index
    %c0_6 = arith.constant 0 : index
    %6 = vector.load %arg3[%c0_5, %c0_6] : memref<1x120xf32, #tpu.memory_space<vmem>>, vector<1x120xf32>
    %c0_7 = arith.constant 0 : index
    %c0_8 = arith.constant 0 : index
    %7 = vector.load %arg4[%c0_7, %c0_8] : memref<1x120xf32, #tpu.memory_space<vmem>>, vector<1x120xf32>
    %cst_9 = arith.constant dense<0.000000e+00> : vector<120xf32>
    %8 = vector.multi_reduction <add>, %5, %cst_9 [0] : vector<2x120xf32> to vector<120xf32>
    %9 = vector.shape_cast %8 : vector<120xf32> to vector<1x120xf32>
    %cst_10 = arith.constant 2.000000e+00 : f32
    %10 = vector.broadcast %cst_10 : f32 to vector<1x120xf32>
    %11 = arith.divf %9, %10 : vector<1x120xf32>
    %12 = vector.broadcast %11 : vector<1x120xf32> to vector<2x120xf32>
    %13 = arith.subf %5, %12 : vector<2x120xf32>
    %14 = arith.mulf %13, %13 : vector<2x120xf32>
    %cst_11 = arith.constant dense<0.000000e+00> : vector<120xf32>
    %15 = vector.multi_reduction <add>, %14, %cst_11 [0] : vector<2x120xf32> to vector<120xf32>
    %16 = vector.shape_cast %15 : vector<120xf32> to vector<1x120xf32>
    %cst_12 = arith.constant 2.000000e+00 : f32
    %17 = vector.broadcast %cst_12 : f32 to vector<1x120xf32>
    %18 = arith.divf %16, %17 : vector<1x120xf32>
    %19 = vector.broadcast %11 : vector<1x120xf32> to vector<2x120xf32>
    %20 = arith.subf %5, %19 : vector<2x120xf32>
    %cst_13 = arith.constant 9.99999974E-6 : f32
    %21 = vector.broadcast %cst_13 : f32 to vector<1x120xf32>
    %22 = arith.addf %18, %21 : vector<1x120xf32>
    %23 = math.rsqrt %22 : vector<1x120xf32>
    %24 = arith.mulf %6, %23 : vector<1x120xf32>
    %25 = vector.broadcast %24 : vector<1x120xf32> to vector<2x120xf32>
    %26 = arith.mulf %20, %25 : vector<2x120xf32>
    %27 = vector.broadcast %7 : vector<1x120xf32> to vector<2x120xf32>
    %28 = arith.addf %26, %27 : vector<2x120xf32>
    %cst_14 = arith.constant 0.000000e+00 : f32
    %29 = vector.broadcast %cst_14 : f32 to vector<2x120xf32>
    %30 = arith.maximumf %28, %29 : vector<2x120xf32>
    %31 = arith.truncf %30 : vector<2x120xf32> to vector<2x120xbf16>
    %c0_15 = arith.constant 0 : index
    %c0_16 = arith.constant 0 : index
    %32 = vector.load %arg5[%c0_15, %c0_16] : memref<120x84xbf16, #tpu.memory_space<vmem>>, vector<120x84xbf16>
    %cst_17 = arith.constant dense<0.000000e+00> : vector<2x84xf32>
    %33 = tpu.matmul %31, %32, %cst_17 {dimension_numbers = #tpu.dot_dimension_numbers<[1], [0], [0], [1], [0, 0, 1, 1], [], []>} : vector<2x120xbf16>, vector<120x84xbf16>, vector<2x84xf32> -> vector<2x84xf32>
    %c0_18 = arith.constant 0 : index
    %c0_19 = arith.constant 0 : index
    %34 = vector.load %arg6[%c0_18, %c0_19] : memref<1x84xf32, #tpu.memory_space<vmem>>, vector<1x84xf32>
    %35 = vector.broadcast %34 : vector<1x84xf32> to vector<2x84xf32>
    %36 = arith.addf %33, %35 : vector<2x84xf32>
    %c0_20 = arith.constant 0 : index
    %c0_21 = arith.constant 0 : index
    %37 = vector.load %arg7[%c0_20, %c0_21] : memref<1x84xf32, #tpu.memory_space<vmem>>, vector<1x84xf32>
    %c0_22 = arith.constant 0 : index
    %c0_23 = arith.constant 0 : index
    %38 = vector.load %arg8[%c0_22, %c0_23] : memref<1x84xf32, #tpu.memory_space<vmem>>, vector<1x84xf32>
    %cst_24 = arith.constant dense<0.000000e+00> : vector<84xf32>
    %39 = vector.multi_reduction <add>, %36, %cst_24 [0] : vector<2x84xf32> to vector<84xf32>
    %40 = vector.shape_cast %39 : vector<84xf32> to vector<1x84xf32>
    %cst_25 = arith.constant 2.000000e+00 : f32
    %41 = vector.broadcast %cst_25 : f32 to vector<1x84xf32>
    %42 = arith.divf %40, %41 : vector<1x84xf32>
    %43 = vector.broadcast %42 : vector<1x84xf32> to vector<2x84xf32>
    %44 = arith.subf %36, %43 : vector<2x84xf32>
    %45 = arith.mulf %44, %44 : vector<2x84xf32>
    %cst_26 = arith.constant dense<0.000000e+00> : vector<84xf32>
    %46 = vector.multi_reduction <add>, %45, %cst_26 [0] : vector<2x84xf32> to vector<84xf32>
    %47 = vector.shape_cast %46 : vector<84xf32> to vector<1x84xf32>
    %cst_27 = arith.constant 2.000000e+00 : f32
    %48 = vector.broadcast %cst_27 : f32 to vector<1x84xf32>
    %49 = arith.divf %47, %48 : vector<1x84xf32>
    %50 = vector.broadcast %42 : vector<1x84xf32> to vector<2x84xf32>
    %51 = arith.subf %36, %50 : vector<2x84xf32>
    %cst_28 = arith.constant 9.99999974E-6 : f32
    %52 = vector.broadcast %cst_28 : f32 to vector<1x84xf32>
    %53 = arith.addf %49, %52 : vector<1x84xf32>
    %54 = math.rsqrt %53 : vector<1x84xf32>
    %55 = arith.mulf %37, %54 : vector<1x84xf32>
    %56 = vector.broadcast %55 : vector<1x84xf32> to vector<2x84xf32>
    %57 = arith.mulf %51, %56 : vector<2x84xf32>
    %58 = vector.broadcast %38 : vector<1x84xf32> to vector<2x84xf32>
    %59 = arith.addf %57, %58 : vector<2x84xf32>
    %cst_29 = arith.constant 0.000000e+00 : f32
    %60 = vector.broadcast %cst_29 : f32 to vector<2x84xf32>
    %61 = arith.maximumf %59, %60 : vector<2x84xf32>
    %62 = arith.truncf %61 : vector<2x84xf32> to vector<2x84xbf16>
    %c0_30 = arith.constant 0 : index
    %c0_31 = arith.constant 0 : index
    %63 = vector.load %arg9[%c0_30, %c0_31] : memref<84x10xbf16, #tpu.memory_space<vmem>>, vector<84x10xbf16>
    %cst_32 = arith.constant dense<0.000000e+00> : vector<2x10xf32>
    %64 = tpu.matmul %62, %63, %cst_32 {dimension_numbers = #tpu.dot_dimension_numbers<[1], [0], [0], [1], [0, 0, 1, 1], [], []>} : vector<2x84xbf16>, vector<84x10xbf16>, vector<2x10xf32> -> vector<2x10xf32>
    %c0_33 = arith.constant 0 : index
    %c0_34 = arith.constant 0 : index
    %65 = vector.load %arg10[%c0_33, %c0_34] : memref<1x10xf32, #tpu.memory_space<vmem>>, vector<1x10xf32>
    %66 = vector.broadcast %65 : vector<1x10xf32> to vector<2x10xf32>
    %67 = arith.addf %64, %66 : vector<2x10xf32>
    %c0_35 = arith.constant 0 : index
    %c0_36 = arith.constant 0 : index
    %68 = vector.load %arg11[%c0_35, %c0_36] : memref<2x10xf32, #tpu.memory_space<vmem>>, vector<2x10xf32>
    tpu.vector_store %arg11[%c0_35, %c0_36], %67 {strides = array<i32>} : memref<2x10xf32, #tpu.memory_space<vmem>>, vector<2x10xf32>,
    return
  }
}

</mosaic_0001>

<bundles_post_ra>
// kernel: net_forward.3
= control target key start
LH: loop header
LB: loop body
LE: loop exit
PB: predicated region body
PF: predicated region fallthrough
CT: control target
= control target key end

     0   :  { %v833_v0 = vmov 0.0   ;;  %vm834_vm0 = vmmov 0   ;;  %v835_v3 = vmov 0   ;;  %vm68_vm1 = vcmask 261120   ;;  %s1076_s0 = inlined_call_operand.vmem [shape: bf16[4,32,288], index: 0, kind: input, shape index: {}]   ;;  %s1077_s1 = inlined_call_operand.vmem [shape: bf16[6,32], index: 1, kind: input, shape index: {}]   ;;  %s1078_s2 = inlined_call_operand.vmem [shape: f32[6,1], index: 2, kind: input, shape index: {}]   ;;  %s1079_s4 = inlined_call_operand.vmem [shape: f32[6,1], index: 4, kind: input, shape index: {}]   ;;  %s1080_s3 = inlined_call_operand.vmem [shape: f32[6,1], index: 3, kind: input, shape index: {}]   ;;  %s1081_s5 = inlined_call_operand.vmem [shape: bf16[6,288], index: 5, kind: output, shape index: {}]  }
   0x1   :  { %762 = vmatprep.subr.bf16.mxu1 %v833_v0  ;;  %v799_v1 = vld [vmem:[%s1076_s0 + $0x4] ss:$12 sps:$4 sm:$0xff]   ;;  %766 = vmatprep.mubr.msk.bf16.mxu1 %vm834_vm0, %v833_v0  ;;  %v801_v2 = vld [vmem:[%s1076_s0 + $0x8] ss:$12 sps:$4 sm:$0xff]   ;;  %v802_v4 = vld [vmem:[%s1076_s0] ss:$12 sps:$4 sm:$0xff]  }
   0x2   :  { %104 = vmatprep.mubr.bf16.mxu0 %v835_v3  ;;  %797 = vset.pattern.permute.xlu0 %v835_v3  ;;  %v803_v5 = vld [vmem:[%s1076_s0 + $0x1c] ss:$12 sps:$4 sm:$0xff]   ;;  %v805_v6 = vld [vmem:[%s1076_s0 + $0x20] ss:$12 sps:$4 sm:$0xff]   ;;  %v806_v7 = vld [vmem:[%s1076_s0 + $0x18] ss:$12 sps:$4 sm:$0xff]  }
   0x3   :  { %72 = vmatprep.subr.bf16.mxu0 %v799_v1  ;;  %798 = vset.pattern.permute.xlu1 %v835_v3  ;;  %v21_v8 = vld [vmem:[%s1077_s1] sm:$0x7]  ;;  %v810_v10 = vld [vmem:[%s1076_s0 + $0x38] ss:$12 sps:$4 sm:$0xff]   ;;  %v807_v11 = vld [vmem:[%s1076_s0 + $0x30] ss:$12 sps:$4 sm:$0xff]  }
   0x4   :  { %763 = vmatpush3.bf16.msra.mxu1 %v801_v2  ;;  %73 = vmatpush1.bf16.msra.mxu0 %v802_v4  ;;  %v809_v9 = vld [vmem:[%s1076_s0 + $0x34] ss:$12 sps:$4 sm:$0xff]   ;;  %v813_v12 = vld [vmem:[%s1076_s0 + $0x4c] ss:$12 sps:$4 sm:$0xff]   ;;  %v814_v13 = vld [vmem:[%s1076_s0 + $0x50] ss:$12 sps:$4 sm:$0xff]  }
   0x5   :  { %764 = vmatprep.subr.bf16.mxu1 %v833_v0  ;;  %74 = vmatprep.subr.bf16.mxu0 %v803_v5  ;;  %v811_v14 = vld [vmem:[%s1076_s0 + $0x48] ss:$12 sps:$4 sm:$0xff]   ;;  %v817_v15 = vld [vmem:[%s1076_s0 + $0x64] ss:$12 sps:$4 sm:$0xff]   ;;  %v815_v17 = vld [vmem:[%s1076_s0 + $0x60] ss:$12 sps:$4 sm:$0xff]  }
   0x6   :  { %v818_v16 = vld [vmem:[%s1076_s0 + $0x68] ss:$12 sps:$4 sm:$0xff]   ;;  %v822_v19 = vld [vmem:[%s1076_s0 + $0x80] ss:$12 sps:$4 sm:$0xff]   ;;  %v819_v21 = vld [vmem:[%s1076_s0 + $0x78] ss:$12 sps:$4 sm:$0xff]  }
   0x7   :  { %v821_v18 = vld [vmem:[%s1076_s0 + $0x7c] ss:$12 sps:$4 sm:$0xff]   ;;  %v22_v20 = vld [vmem:[%s1078_s2] sm:$0x3f]  ;;  %v829_v25 = vld [vmem:[%s1076_s0 + $0xac] ss:$12 sps:$4 sm:$0xff]  }
   0x8   :  { %765 = vmatpush3.bf16.msra.mxu1 %v805_v6  ;;  %75 = vmatpush1.bf16.msra.mxu0 %v806_v7  ;;  %v825_v22 = vld [vmem:[%s1076_s0 + $0x94] ss:$12 sps:$4 sm:$0xff]   ;;  %v826_v23 = vld [vmem:[%s1076_s0 + $0x98] ss:$12 sps:$4 sm:$0xff]   ;;  %v823_v24 = vld [vmem:[%s1076_s0 + $0x90] ss:$12 sps:$4 sm:$0xff]  }
   0x9   :  { %770 = vmatprep.subr.bf16.mxu1 %v833_v0  ;;  %194 = vmatprep.subr.bf16.mxu0 %v809_v9  ;;  %v830_v26 = vld [vmem:[%s1076_s0 + $0xb0] ss:$12 sps:$4 sm:$0xff]   ;;  %v827_v27 = vld [vmem:[%s1076_s0 + $0xa8] ss:$12 sps:$4 sm:$0xff]   ;;  %vm519_vm2 = vcmask 1045504   ;;  %vm523_vm3 = vcmask 259072  }
   0xa   :  { %33 = vperm.xlu0 %797, %v22_v20   ;;  %vm684_vm4 = vcmask 256000  }
   0xb   :  { %767 = vmatmul.mubr.msk.bf16.vlgmr.msra.gmra.mrb[0].mxu1 %vm68_vm1, %v21_v8  ;;  %696 = vmatmul.mubr.msk.bf16.vlgmr.msra.gmra.mrb[0].mxu0 %vm68_vm1, %v21_v8 }
   0xc   :  { %771 = vmatpush3.bf16.msra.mxu1 %v810_v10  ;;  %195 = vmatpush1.bf16.msra.mxu0 %v807_v11 }
   0xd   :  { %772 = vmatprep.subr.bf16.mxu1 %v833_v0  ;;  %196 = vmatprep.subr.bf16.mxu0 %v813_v12 }
   0xe   :  { %774 = vmatprep.mubr.msk.bf16.mxu1 %vm834_vm0, %v833_v0  ;;  %226 = vmatprep.mubr.bf16.mxu0 %v835_v3 }
  0x10   :  { %773 = vmatpush3.bf16.msra.mxu1 %v814_v13  ;;  %197 = vmatpush1.bf16.msra.mxu0 %v811_v14 }
  0x11   :  { %778 = vmatprep.subr.bf16.mxu1 %v833_v0  ;;  %316 = vmatprep.subr.bf16.mxu0 %v817_v15 }
  0x13   :  { %775 = vmatmul.mubr.msk.bf16.vlgmr.msra.gmra.mrb[4].mxu1 %vm68_vm1, %v21_v8  ;;  %712 = vmatmul.mubr.msk.bf16.vlgmr.msra.gmra.mrb[4].mxu0 %vm68_vm1, %v21_v8 }
  0x14   :  { %779 = vmatpush3.bf16.msra.mxu1 %v818_v16  ;;  %317 = vmatpush1.bf16.msra.mxu0 %v815_v17 }
  0x15   :  { %780 = vmatprep.subr.bf16.mxu1 %v833_v0  ;;  %318 = vmatprep.subr.bf16.mxu0 %v821_v18 }
  0x16   :  { %782 = vmatprep.mubr.msk.bf16.mxu1 %vm834_vm0, %v833_v0  ;;  %348 = vmatprep.mubr.bf16.mxu0 %v835_v3 }
  0x18   :  { %781 = vmatpush3.bf16.msra.mxu1 %v822_v19  ;;  %319 = vmatpush1.bf16.msra.mxu0 %v819_v21 }
  0x19   :  { %786 = vmatprep.subr.bf16.mxu1 %v833_v0  ;;  %438 = vmatprep.subr.bf16.mxu0 %v825_v22 }
  0x1b   :  { %783 = vmatmul.mubr.msk.bf16.vlgmr.msra.gmra.mrb[8].mxu1 %vm68_vm1, %v21_v8  ;;  %728 = vmatmul.mubr.msk.bf16.vlgmr.msra.gmra.mrb[8].mxu0 %vm68_vm1, %v21_v8 }
  0x1c   :  { %787 = vmatpush3.bf16.msra.mxu1 %v826_v23  ;;  %439 = vmatpush1.bf16.msra.mxu0 %v823_v24 }
  0x1d   :  { %788 = vmatprep.subr.bf16.mxu1 %v833_v0  ;;  %440 = vmatprep.subr.bf16.mxu0 %v829_v25 }
  0x1e   :  { %790 = vmatprep.mubr.msk.bf16.mxu1 %vm834_vm0, %v833_v0  ;;  %470 = vmatprep.mubr.bf16.mxu0 %v835_v3 }
  0x20   :  { %789 = vmatpush3.bf16.msra.mxu1 %v830_v26  ;;  %441 = vmatpush1.bf16.msra.mxu0 %v827_v27  ;;  %v614_v26 = vld [vmem:[%s1079_s4] sm:$0x3f] }
  0x23   :  { %791 = vmatmul.mubr.msk.bf16.vlgmr.msra.gmra.mrb[12].mxu1 %vm68_vm1, %v21_v8  ;;  %744 = vmatmul.mubr.msk.bf16.vlgmr.msra.gmra.mrb[12].mxu0 %vm68_vm1, %v21_v8 }
  0x89   :  { %v34_v28 = vpop.permute.xlu0 %33 }
  0xde   :  { %v147_v29 = vpop.f32.mrb[0].mxu1  ;;  %v106_v30 = vpop.f32.mrb[0].mxu0 }
  0xdf   :  { %v974_v31 = vadd.f32 %v147_v29, %v34_v28  ;;  %v768_v32 = vpop.f32.mrb[1].mxu1  ;;  %v108_v33 = vpop.f32.mrb[1].mxu0  ;;  %v976_v35 = vadd.f32 %v106_v30, %v34_v28 }
  0xe0   :  { %v150_v34 = vpop.f32.mrb[2].mxu1  ;;  %v978_v36 = vadd.f32 %v108_v33, %v34_v28  ;;  %v110_v37 = vpop.f32.mrb[2].mxu0 }
  0xe1   :  { %v769_v38 = vpop.f32.mrb[3].mxu1  ;;  %v111_v39 = vpop.f32.mrb[3].mxu0  ;;  %v520_v40 = vsel %vm519_vm2, %v976_v35, 0.0  ;;  %v524_v42 = vsel %vm523_vm3, %v974_v31, 0.0 }
  0xe2   :  { %v521_v41 = vsel %vm519_vm2, %v978_v36, 0.0 }
  0xe3   :  { %v522_v43 = vadd.f32 %v521_v41, %v520_v40 }
  0xe5   :  { %v525_v45 = vadd.f32 %v524_v42, %v522_v43 }
  0xe6   :  { %v269_v44 = vpop.f32.mrb[4].mxu1  ;;  %v228_v46 = vpop.f32.mrb[4].mxu0 }
  0xe7   :  { %v986_v47 = vadd.f32 %v269_v44, %v34_v28  ;;  %v776_v48 = vpop.f32.mrb[5].mxu1  ;;  %v229_v49 = vadd.f32 %v228_v46, %v34_v28  ;;  %v230_v50 = vpop.f32.mrb[5].mxu0  ;;  %526 = vadd.xlane.f32.xlu0 %v525_v45 }
  0xe8   :  { %v272_v51 = vpop.f32.mrb[6].mxu1  ;;  %v231_v52 = vadd.f32 %v230_v50, %v34_v28  ;;  %v232_v53 = vpop.f32.mrb[6].mxu0 }
  0xe9   :  { %v777_v54 = vpop.f32.mrb[7].mxu1  ;;  %v528_v55 = vsel %vm519_vm2, %v229_v49, 0.0  ;;  %v233_v56 = vpop.f32.mrb[7].mxu0  ;;  %v531_v58 = vsel %vm523_vm3, %v986_v47, 0.0 }
  0xea   :  { %v529_v57 = vsel %vm519_vm2, %v231_v52, 0.0 }
  0xeb   :  { %v530_v59 = vadd.f32 %v529_v57, %v528_v55 }
  0xed   :  { %v532_v61 = vadd.f32 %v531_v58, %v530_v59 }
  0xee   :  { %v391_v60 = vpop.f32.mrb[8].mxu1  ;;  %v350_v62 = vpop.f32.mrb[8].mxu0 }
  0xef   :  { %v784_v63 = vpop.f32.mrb[9].mxu1  ;;  %v351_v0 = vadd.f32 %v350_v62, %v34_v28  ;;  %v352_v1 = vpop.f32.mrb[9].mxu0  ;;  %533 = vadd.xlane.f32.xlu1 %v532_v61  ;;  %v392_v4 = vadd.f32 %v391_v60, %v34_v28 }
  0xf0   :  { %v394_v2 = vpop.f32.mrb[10].mxu1  ;;  %v353_v3 = vadd.f32 %v352_v1, %v34_v28  ;;  %v354_v5 = vpop.f32.mrb[10].mxu0 }
  0xf1   :  { %v785_v6 = vpop.f32.mrb[11].mxu1  ;;  %v536_v7 = vsel %vm519_vm2, %v351_v0, 0.0  ;;  %v355_v8 = vpop.f32.mrb[11].mxu0  ;;  %v539_v11 = vsel %vm523_vm3, %v392_v4, 0.0 }
  0xf2   :  { %v537_v9 = vsel %vm519_vm2, %v353_v3, 0.0 }
  0xf3   :  { %v538_v10 = vadd.f32 %v537_v9, %v536_v7 }
  0xf5   :  { %v540_v13 = vadd.f32 %v539_v11, %v538_v10 }
  0xf6   :  { %v513_v12 = vpop.f32.mrb[12].mxu1  ;;  %v472_v14 = vpop.f32.mrb[12].mxu0 }
  0xf7   :  { %v792_v15 = vpop.f32.mrb[13].mxu1  ;;  %v473_v16 = vadd.f32 %v472_v14, %v34_v28  ;;  %v474_v17 = vpop.f32.mrb[13].mxu0  ;;  %541 = vadd.xlane.f32.xlu1 %v540_v13  ;;  %v514_v19 = vadd.f32 %v513_v12, %v34_v28 }
  0xf8   :  { %v516_v18 = vpop.f32.mrb[14].mxu1  ;;  %v475_v20 = vadd.f32 %v474_v17, %v34_v28  ;;  %v476_v21 = vpop.f32.mrb[14].mxu0 }
  0xf9   :  { %v793_v22 = vpop.f32.mrb[15].mxu1  ;;  %v544_v23 = vsel %vm519_vm2, %v473_v16, 0.0  ;;  %v477_v24 = vpop.f32.mrb[15].mxu0  ;;  %v547_v29 = vsel %vm523_vm3, %v514_v19, 0.0 }
  0xfa   :  { %v545_v25 = vsel %vm519_vm2, %v475_v20, 0.0 }
  0xfb   :  { %v546_v27 = vadd.f32 %v545_v25, %v544_v23 }
  0xfd   :  { %625 = vperm.xlu0 %797, %v614_v26   ;;  %v548_v30 = vadd.f32 %v547_v29, %v546_v27  ;;  %v610_v27 = vld [vmem:[%s1080_s3] sm:$0x3f] }
  0xff   :  { %549 = vadd.xlane.f32.xlu1 %v548_v30 }
 0x174   :  { %v527_v33 = vpop.xlane.xlu0 %526 }
 0x17c   :  { %v534_v32 = vpop.xlane.xlu1 %533 }
 0x17d   :  { %v535_v34 = vadd.f32 %v534_v32, %v527_v33 }
 0x184   :  { %v542_v28 = vpop.xlane.xlu1 %541 }
 0x185   :  { %v543_v37 = vadd.f32 %v542_v28, %v535_v34 }
 0x18c   :  { %v550_v38 = vpop.xlane.xlu1 %549 }
 0x18d   :  { %v551_v39 = vadd.f32 %v550_v38, %v543_v37  ;;  %v626_v38 = vpop.permute.xlu0 %625 }
 0x18f   :  { %v553_v40 = vmul.f32 0.00086805556, %v551_v39 }
 0x191   :  { %v1002_v41 = vsub.f32 %v976_v35, %v553_v40  ;;  %v1005_v42 = vsub.f32 %v978_v36, %v553_v40  ;;  %v1008_v43 = vsub.f32 %v974_v31, %v553_v40  ;;  %v1010_v44 = vsub.f32 %v229_v49, %v553_v40 }
 0x192   :  { %v1012_v45 = vsub.f32 %v231_v52, %v553_v40  ;;  %v1015_v46 = vsub.f32 %v986_v47, %v553_v40  ;;  %v1017_v48 = vsub.f32 %v351_v0, %v553_v40  ;;  %v1019_v50 = vsub.f32 %v353_v3, %v553_v40 }
 0x193   :  { %v557_v35 = vmul.f32 %v1002_v41, %v1002_v41  ;;  %v558_v36 = vmul.f32 %v1005_v42, %v1005_v42  ;;  %v559_v31 = vmul.f32 %v1008_v43, %v1008_v43  ;;  %v570_v49 = vmul.f32 %v1010_v44, %v1010_v44 }
 0x194   :  { %v571_v47 = vmul.f32 %v1012_v45, %v1012_v45  ;;  %v584_v54 = vmul.f32 %v1017_v48, %v1017_v48  ;;  %v585_v57 = vmul.f32 %v1019_v50, %v1019_v50  ;;  %v572_v59 = vmul.f32 %v1015_v46, %v1015_v46 }
 0x195   :  { %v560_v51 = vsel %vm519_vm2, %v557_v35, 0.0  ;;  %v561_v52 = vsel %vm519_vm2, %v558_v36, 0.0  ;;  %v573_v53 = vsel %vm519_vm2, %v570_v49, 0.0  ;;  %v563_v58 = vsel %vm523_vm3, %v559_v31, 0.0 }
 0x196   :  { %v562_v55 = vadd.f32 %v561_v52, %v560_v51  ;;  %v574_v56 = vsel %vm519_vm2, %v571_v47, 0.0  ;;  %v583_v60 = vsub.f32 %v392_v4, %v553_v40  ;;  %v1042_v61 = vsub.f32 %v473_v16, %v553_v40 }
 0x197   :  { %v575_v63 = vadd.f32 %v574_v56, %v573_v53  ;;  %v1044_v0 = vsub.f32 %v475_v20, %v553_v40  ;;  %v587_v1 = vsel %vm519_vm2, %v584_v54, 0.0  ;;  %v588_v2 = vsel %vm519_vm2, %v585_v57, 0.0 }
 0x198   :  { %v564_v62 = vadd.f32 %v563_v58, %v562_v55  ;;  %v598_v3 = vmul.f32 %v1042_v61, %v1042_v61  ;;  %v576_v6 = vsel %vm523_vm3, %v572_v59, 0.0  ;;  %v586_v4 = vmul.f32 %v583_v60, %v583_v60 }
 0x199   :  { %v599_v5 = vmul.f32 %v1044_v0, %v1044_v0  ;;  %v597_v7 = vsub.f32 %v514_v19, %v553_v40  ;;  %v577_v8 = vadd.f32 %v576_v6, %v575_v63  ;;  %v589_v9 = vadd.f32 %v588_v2, %v587_v1 }
 0x19a   :  { %565 = vadd.xlane.f32.xlu1 %v564_v62  ;;  %v601_v10 = vsel %vm519_vm2, %v598_v3, 0.0  ;;  %v590_v12 = vsel %vm523_vm3, %v586_v4, 0.0 }
 0x19b   :  { %v602_v11 = vsel %vm519_vm2, %v599_v5, 0.0  ;;  %v600_v13 = vmul.f32 %v597_v7, %v597_v7  ;;  %v591_v14 = vadd.f32 %v590_v12, %v589_v9 }
 0x19c   :  { %v603_v15 = vadd.f32 %v602_v11, %v601_v10 }
 0x19d   :  { %v604_v16 = vsel %vm523_vm3, %v600_v13, 0.0 }
 0x19e   :  { %578 = vadd.xlane.f32.xlu1 %v577_v8  ;;  %v605_v17 = vadd.f32 %v604_v16, %v603_v15 }
 0x1a2   :  { %592 = vadd.xlane.f32.xlu1 %v591_v14 }
 0x1a6   :  { %606 = vadd.xlane.f32.xlu1 %v605_v17 }
 0x227   :  { %v566_v18 = vpop.xlane.xlu1 %565 }
 0x22b   :  { %v579_v20 = vpop.xlane.xlu1 %578 }
 0x22c   :  { %v580_v21 = vadd.f32 %v579_v20, %v566_v18 }
 0x22f   :  { %v593_v19 = vpop.xlane.xlu1 %592 }
 0x230   :  { %v594_v22 = vadd.f32 %v593_v19, %v580_v21 }
 0x233   :  { %v607_v23 = vpop.xlane.xlu1 %606 }
 0x234   :  { %v608_v24 = vadd.f32 %v607_v23, %v594_v22 }
 0x236   :  { %v609_v25 = vmul.f32 0.00086805556, %v608_v24 }
 0x238   :  { %v611_v26 = vadd.f32 1e-05, %v609_v25 }
 0x23a   :  { %831 = vrsqrt.f32 %v611_v26 }
 0x244   :  { %v832_v29 = vpop.eup %831 }
 0x245   :  { %v613_v30 = vmul.f32 %v832_v29, %v610_v27 }
 0x247   :  { %617 = vperm.xlu1 %798, %v613_v30  }
 0x2c6   :  { %v618_v32 = vpop.permute.xlu1 %617 }
 0x2c7   :  { %v620_v33 = vmul.f32 %v618_v32, %v1002_v41  ;;  %v621_v28 = vmul.f32 %v618_v32, %v1005_v42  ;;  %v622_v34 = vmul.f32 %v618_v32, %v1008_v43  ;;  %v634_v37 = vmul.f32 %v618_v32, %v1010_v44 }
 0x2c8   :  { %v635_v39 = vmul.f32 %v618_v32, %v1012_v45  ;;  %v636_v40 = vmul.f32 %v618_v32, %v1015_v46  ;;  %v643_v35 = vmul.f32 %v618_v32, %v1017_v48  ;;  %v644_v36 = vmul.f32 %v618_v32, %v1019_v50 }
 0x2c9   :  { %v628_v31 = vadd.f32 %v626_v38, %v620_v33  ;;  %v629_v49 = vadd.f32 %v626_v38, %v621_v28  ;;  %v630_v47 = vadd.f32 %v626_v38, %v622_v34  ;;  %v637_v51 = vadd.f32 %v634_v37, %v626_v38 }
 0x2ca   :  { %v638_v41 = vadd.f32 %v635_v39, %v626_v38  ;;  %v639_v52 = vadd.f32 %v636_v40, %v626_v38  ;;  %v645_v42 = vmul.f32 %v618_v32, %v583_v60  ;;  %v646_v53 = vadd.f32 %v643_v35, %v626_v38 }
 0x2cb   :  { %v631_v43 = vmax.f32 %v628_v31, 0.0  ;;  %v632_v54 = vmax.f32 %v629_v49, 0.0  ;;  %v633_v44 = vmax.f32 %v630_v47, 0.0  ;;  %v640_v55 = vmax.f32 %v637_v51, 0.0 }
 0x2cc   :  { %v641_v56 = vmax.f32 %v638_v41, 0.0  ;;  %v647_v45 = vadd.f32 %v644_v36, %v626_v38  ;;  %v648_v57 = vadd.f32 %v645_v42, %v626_v38  ;;  %v642_v46 = vmax.f32 %v639_v52, 0.0 }
 0x2cd   :  { %v652_v48 = vmul.f32 %v618_v32, %v1042_v61  ;;  %v653_v50 = vmul.f32 %v618_v32, %v1044_v0  ;;  %v654_v58 = vmul.f32 %v618_v32, %v597_v7  ;;  %v649_v59 = vmax.f32 %v646_v53, 0.0 }
 0x2ce   :  { %v650_v62 = vmax.f32 %v647_v45, 0.0  ;;  %v651_v63 = vmax.f32 %v648_v57, 0.0  ;;  %v661_v3 = vmax.f32 %v631_v43, %v640_v55  ;;  %v662_v5 = vmax.f32 %v632_v54, %v641_v56 }
 0x2cf   :  { %v655_v1 = vadd.f32 %v652_v48, %v626_v38  ;;  %v656_v2 = vadd.f32 %v653_v50, %v626_v38  ;;  %v657_v60 = vadd.f32 %v654_v58, %v626_v38  ;;  %v663_v9 = vmax.f32 %v633_v44, %v642_v46 }
 0x2d1   :  { %v658_v6 = vmax.f32 %v655_v1, 0.0  ;;  %v659_v4 = vmax.f32 %v656_v2, 0.0  ;;  %v660_v8 = vmax.f32 %v657_v60, 0.0 }
 0x2d3   :  { %v664_v10 = vmax.f32 %v649_v59, %v658_v6  ;;  %v665_v11 = vmax.f32 %v650_v62, %v659_v4  ;;  %v666_v12 = vmax.f32 %v651_v63, %v660_v8 }
 0x2d5   :  { %v667_v13 = vmax.f32 %v661_v3, %v664_v10  ;;  %v668_v61 = vmax.f32 %v662_v5, %v665_v11  ;;  %v669_v14 = vmax.f32 %v663_v9, %v666_v12 }
 0x2d7   :  { %v748_v0 = vpack.c.bf16 %v668_v61, %v667_v13  ;;  %v749_v7 = vpack.c.bf16 %v669_v14, %v669_v14 }
 0x2d9   :  { %683 = vst [vmem:[%s1081_s5] sm:$0x77] %v748_v0  ;;  %685 = vst.msk [vmem:[%s1081_s5 + $0x8] sm:$0x7] %vm684_vm4, %v749_v7 }

// kernel: net_forward.4
= control target key start
LH: loop header
LB: loop body
LE: loop exit
PB: predicated region body
PF: predicated region fallthrough
CT: control target
= control target key end

     0   :  { %v851_v0 = vmov 0   ;;  %vm124_vm0 = vcmask 261120   ;;  %vm684_vm1 = vcmask 257024   ;;  %s1135_s0 = inlined_call_operand.vmem [shape: bf16[4,160,32], index: 0, kind: input, shape index: {}]   ;;  %s1136_s1 = inlined_call_operand.vmem [shape: bf16[16,160], index: 1, kind: input, shape index: {}]   ;;  %s1137_s2 = inlined_call_operand.vmem [shape: f32[16,1], index: 2, kind: input, shape index: {}]   ;;  %s1138_s3 = inlined_call_operand.vmem [shape: f32[16,1], index: 3, kind: input, shape index: {}]   ;;  %s1139_s4 = inlined_call_operand.vmem [shape: f32[16,1], index: 4, kind: input, shape index: {}]   ;;  %s1140_s5 = inlined_call_operand.vmem [shape: bf16[16,32], index: 5, kind: output, shape index: {}]  }
   0x1   :  { %128 = vmatprep.subr.bf16.mxu0 %v851_v0  ;;  %250 = vmatprep.subr.bf16.mxu1 %v851_v0  ;;  %v804_v1 = vld [vmem:[%s1135_s0] sm:$0xff]   ;;  %v805_v2 = vld [vmem:[%s1135_s0 + $0x50] sm:$0xff]   ;;  %v806_v3 = vld [vmem:[%s1135_s0 + $0x8] sm:$0xff]  }
   0x2   :  { %802 = vset.pattern.permute.xlu0 %v851_v0  ;;  %803 = vset.pattern.permute.xlu1 %v851_v0  ;;  %v807_v4 = vld [vmem:[%s1135_s0 + $0x58] sm:$0xff]   ;;  %v808_v5 = vld [vmem:[%s1135_s0 + $0x10] sm:$0xff]   ;;  %v809_v6 = vld [vmem:[%s1135_s0 + $0x60] sm:$0xff]  }
   0x3   :  { %129 = vmatpush1.bf16.msra.mxu0 %v804_v1  ;;  %251 = vmatpush1.bf16.msra.mxu1 %v805_v2  ;;  %v810_v7 = vld [vmem:[%s1135_s0 + $0x18] sm:$0xff]   ;;  %v811_v8 = vld [vmem:[%s1135_s0 + $0x68] sm:$0xff]   ;;  %v812_v9 = vld [vmem:[%s1135_s0 + $0x20] sm:$0xff]  }
   0x4   :  { %130 = vmatprep.subr.bf16.mxu0 %v851_v0  ;;  %252 = vmatprep.subr.bf16.mxu1 %v851_v0  ;;  %v813_v10 = vld [vmem:[%s1135_s0 + $0x70] sm:$0xff]   ;;  %v814_v11 = vld [vmem:[%s1135_s0 + $0x28] sm:$0xff]   ;;  %v815_v12 = vld [vmem:[%s1135_s0 + $0x78] sm:$0xff]  }
   0x5   :  { %v824_v13 = vld [vmem:[%s1136_s1 + $0x4] ss:$8 sps:$4 sm:$0xff]   ;;  %v816_v14 = vld [vmem:[%s1135_s0 + $0x30] sm:$0xff]   ;;  %v818_v16 = vld [vmem:[%s1135_s0 + $0x38] sm:$0xff]  }
   0x6   :  { %703 = vmatprep.mubr.msk.bf16.mxu0 %vm124_vm0, %v824_v13  ;;  %v817_v15 = vld [vmem:[%s1135_s0 + $0x80] sm:$0xff]   ;;  %734 = vmatprep.mubr.msk.bf16.mxu1 %vm124_vm0, %v824_v13  ;;  %v819_v17 = vld [vmem:[%s1135_s0 + $0x88] sm:$0xff]   ;;  %v821_v19 = vld [vmem:[%s1135_s0 + $0x90] sm:$0xff]  }
   0x7   :  { %131 = vmatpush1.bf16.msra.mxu0 %v806_v3  ;;  %253 = vmatpush1.bf16.msra.mxu1 %v807_v4  ;;  %v820_v18 = vld [vmem:[%s1135_s0 + $0x40] sm:$0xff]   ;;  %v822_v20 = vld [vmem:[%s1135_s0 + $0x48] sm:$0xff]   ;;  %v823_v21 = vld [vmem:[%s1135_s0 + $0x98] sm:$0xff]  }
   0x8   :  { %132 = vmatprep.subr.bf16.mxu0 %v851_v0  ;;  %254 = vmatprep.subr.bf16.mxu1 %v851_v0  ;;  %v972_v22 = vld [vmem:[%s1136_s1] ss:$8 sps:$4 sm:$0xff]   ;;  %v828_v24 = vld [vmem:[%s1135_s0 + $0xf0] sm:$0xff]   ;;  %v830_v27 = vld [vmem:[%s1135_s0 + $0xf8] sm:$0xff]  }
   0x9   :  { %v827_v23 = vld [vmem:[%s1135_s0 + $0xa0] sm:$0xff]   ;;  %v829_v25 = vld [vmem:[%s1135_s0 + $0xa8] sm:$0xff]   ;;  %v831_v28 = vld [vmem:[%s1135_s0 + $0xb0] sm:$0xff]  }
   0xa   :  { %v23_v26 = vld [vmem:[%s1137_s2] sm:$0xff]  ;;  %v24_v29 = vld [vmem:[%s1137_s2 + $0x8] sm:$0xff]  ;;  %v833_v31 = vld [vmem:[%s1135_s0 + $0xb8] sm:$0xff]  }
   0xb   :  { %133 = vmatpush1.bf16.msra.mxu0 %v808_v5  ;;  %255 = vmatpush1.bf16.msra.mxu1 %v809_v6  ;;  %v832_v30 = vld [vmem:[%s1135_s0 + $0x100] sm:$0xff]   ;;  %v834_v32 = vld [vmem:[%s1135_s0 + $0x108] sm:$0xff]   ;;  %v836_v34 = vld [vmem:[%s1135_s0 + $0x110] sm:$0xff]  }
   0xc   :  { %134 = vmatprep.subr.bf16.mxu0 %v851_v0  ;;  %256 = vmatprep.subr.bf16.mxu1 %v851_v0  ;;  %v835_v33 = vld [vmem:[%s1135_s0 + $0xc0] sm:$0xff]   ;;  %v837_v35 = vld [vmem:[%s1135_s0 + $0xc8] sm:$0xff]   ;;  %v838_v36 = vld [vmem:[%s1135_s0 + $0x118] sm:$0xff]  }
   0xd   :  { %47 = vperm.xlu0 %802, %v23_v26   ;;  %v839_v37 = vld [vmem:[%s1135_s0 + $0xd0] sm:$0xff]   ;;  %v840_v38 = vld [vmem:[%s1135_s0 + $0x120] sm:$0xff]   ;;  %v841_v39 = vld [vmem:[%s1135_s0 + $0xd8] sm:$0xff]  }
   0xe   :  { %v842_v40 = vld [vmem:[%s1135_s0 + $0x128] sm:$0xff]   ;;  %v843_v41 = vld [vmem:[%s1135_s0 + $0xe0] sm:$0xff]   ;;  %v844_v42 = vld [vmem:[%s1135_s0 + $0x130] sm:$0xff]  }
   0xf   :  { %135 = vmatpush1.bf16.msra.mxu0 %v810_v7  ;;  %257 = vmatpush1.bf16.msra.mxu1 %v811_v8  ;;  %v845_v43 = vld [vmem:[%s1135_s0 + $0xe8] sm:$0xff]   ;;  %v846_v44 = vld [vmem:[%s1135_s0 + $0x138] sm:$0xff]  }
  0x10   :  { %136 = vmatprep.subr.bf16.mxu0 %v851_v0  ;;  %258 = vmatprep.subr.bf16.mxu1 %v851_v0 }
  0x11   :  { %52 = vperm.xlu0 %802, %v24_v29  }
  0x13   :  { %137 = vmatpush1.bf16.msra.mxu0 %v812_v9  ;;  %259 = vmatpush1.bf16.msra.mxu1 %v813_v10 }
  0x14   :  { %138 = vmatprep.subr.bf16.mxu0 %v851_v0  ;;  %260 = vmatprep.subr.bf16.mxu1 %v851_v0 }
  0x17   :  { %139 = vmatpush1.bf16.msra.mxu0 %v814_v11  ;;  %261 = vmatpush1.bf16.msra.mxu1 %v815_v12 }
  0x18   :  { %140 = vmatprep.subr.bf16.mxu0 %v851_v0  ;;  %262 = vmatprep.subr.bf16.mxu1 %v851_v0 }
  0x1b   :  { %141 = vmatpush1.bf16.msra.mxu0 %v816_v14  ;;  %263 = vmatpush1.bf16.msra.mxu1 %v817_v15 }
  0x1c   :  { %142 = vmatprep.subr.bf16.mxu0 %v851_v0  ;;  %264 = vmatprep.subr.bf16.mxu1 %v851_v0 }
  0x1f   :  { %143 = vmatpush1.bf16.msra.mxu0 %v818_v16  ;;  %265 = vmatpush1.bf16.msra.mxu1 %v819_v17 }
  0x20   :  { %144 = vmatprep.subr.bf16.mxu0 %v851_v0  ;;  %266 = vmatprep.subr.bf16.mxu1 %v851_v0 }
  0x23   :  { %145 = vmatpush1.bf16.msra.mxu0 %v820_v18  ;;  %267 = vmatpush1.bf16.msra.mxu1 %v821_v19 }
  0x24   :  { %146 = vmatprep.subr.bf16.mxu0 %v851_v0  ;;  %268 = vmatprep.subr.bf16.mxu1 %v851_v0 }
  0x27   :  { %147 = vmatpush1.bf16.msra.mxu0 %v822_v20  ;;  %269 = vmatpush1.bf16.msra.mxu1 %v823_v21 }
  0x28   :  { %372 = vmatprep.subr.bf16.mxu0 %v851_v0  ;;  %494 = vmatprep.subr.bf16.mxu1 %v851_v0 }
  0x2a   :  { %161 = vmatmul.mubr.bf16.vlgmr.msra.gmra.mrb[0].mxu0 %v972_v22  ;;  %283 = vmatmul.mubr.bf16.vlgmr.msra.gmra.mrb[0].mxu1 %v972_v22 }
  0x2b   :  { %373 = vmatpush1.bf16.msra.mxu0 %v827_v23  ;;  %495 = vmatpush1.bf16.msra.mxu1 %v828_v24 }
  0x2c   :  { %374 = vmatprep.subr.bf16.mxu0 %v851_v0  ;;  %496 = vmatprep.subr.bf16.mxu1 %v851_v0 }
  0x2d   :  { %765 = vmatprep.mubr.msk.bf16.mxu0 %vm124_vm0, %v824_v13  ;;  %796 = vmatprep.mubr.msk.bf16.mxu1 %vm124_vm0, %v824_v13 }
  0x2f   :  { %375 = vmatpush1.bf16.msra.mxu0 %v829_v25  ;;  %497 = vmatpush1.bf16.msra.mxu1 %v830_v27 }
  0x30   :  { %376 = vmatprep.subr.bf16.mxu0 %v851_v0  ;;  %498 = vmatprep.subr.bf16.mxu1 %v851_v0 }
  0x33   :  { %377 = vmatpush1.bf16.msra.mxu0 %v831_v28  ;;  %499 = vmatpush1.bf16.msra.mxu1 %v832_v30 }
  0x34   :  { %378 = vmatprep.subr.bf16.mxu0 %v851_v0  ;;  %500 = vmatprep.subr.bf16.mxu1 %v851_v0 }
  0x37   :  { %379 = vmatpush1.bf16.msra.mxu0 %v833_v31  ;;  %501 = vmatpush1.bf16.msra.mxu1 %v834_v32 }
  0x38   :  { %380 = vmatprep.subr.bf16.mxu0 %v851_v0  ;;  %502 = vmatprep.subr.bf16.mxu1 %v851_v0 }
  0x3b   :  { %381 = vmatpush1.bf16.msra.mxu0 %v835_v33  ;;  %503 = vmatpush1.bf16.msra.mxu1 %v836_v34 }
  0x3c   :  { %382 = vmatprep.subr.bf16.mxu0 %v851_v0  ;;  %504 = vmatprep.subr.bf16.mxu1 %v851_v0 }
  0x3f   :  { %383 = vmatpush1.bf16.msra.mxu0 %v837_v35  ;;  %505 = vmatpush1.bf16.msra.mxu1 %v838_v36 }
  0x40   :  { %384 = vmatprep.subr.bf16.mxu0 %v851_v0  ;;  %506 = vmatprep.subr.bf16.mxu1 %v851_v0 }
  0x43   :  { %385 = vmatpush1.bf16.msra.mxu0 %v839_v37  ;;  %507 = vmatpush1.bf16.msra.mxu1 %v840_v38 }
  0x44   :  { %386 = vmatprep.subr.bf16.mxu0 %v851_v0  ;;  %508 = vmatprep.subr.bf16.mxu1 %v851_v0 }
  0x47   :  { %387 = vmatpush1.bf16.msra.mxu0 %v841_v39  ;;  %509 = vmatpush1.bf16.msra.mxu1 %v842_v40 }
  0x48   :  { %388 = vmatprep.subr.bf16.mxu0 %v851_v0  ;;  %510 = vmatprep.subr.bf16.mxu1 %v851_v0 }
  0x4b   :  { %389 = vmatpush1.bf16.msra.mxu0 %v843_v41  ;;  %511 = vmatpush1.bf16.msra.mxu1 %v844_v42 }
  0x4c   :  { %390 = vmatprep.subr.bf16.mxu0 %v851_v0  ;;  %512 = vmatprep.subr.bf16.mxu1 %v851_v0 }
  0x4f   :  { %391 = vmatpush1.bf16.msra.mxu0 %v845_v43  ;;  %513 = vmatpush1.bf16.msra.mxu1 %v846_v44 }
  0x52   :  { %405 = vmatmul.mubr.bf16.vlgmr.msra.gmra.mrb[4].mxu0 %v972_v22  ;;  %527 = vmatmul.mubr.bf16.vlgmr.msra.gmra.mrb[4].mxu1 %v972_v22 }
  0x8c   :  { %v48_v45 = vpop.permute.xlu0 %47 }
  0x90   :  { %v53_v47 = vpop.permute.xlu0 %52 }
  0xfd   :  { %v162_v46 = vpop.f32.mrb[0].mxu0  ;;  %v284_v50 = vpop.f32.mrb[0].mxu1 }
  0xfe   :  { %v163_v48 = vadd.f32 %v162_v46, %v48_v45  ;;  %v164_v49 = vpop.f32.mrb[1].mxu0  ;;  %v285_v51 = vadd.f32 %v284_v50, %v48_v45  ;;  %v286_v53 = vpop.f32.mrb[1].mxu1 }
  0xff   :  { %v165_v52 = vpop.f32.mrb[2].mxu0  ;;  %v287_v56 = vpop.f32.mrb[2].mxu1 }
 0x100   :  { %v166_v54 = vadd.f32 %v165_v52, %v53_v47  ;;  %v167_v55 = vpop.f32.mrb[3].mxu0  ;;  %v535_v57 = vsel %vm124_vm0, %v163_v48, 0.0  ;;  %v289_v58 = vpop.f32.mrb[3].mxu1  ;;  %v541_v59 = vsel %vm124_vm0, %v285_v51, 0.0  ;;  %v288_v60 = vadd.f32 %v287_v56, %v53_v47 }
 0x101   :  { %536 = vadd.xlane.f32.xlu1 %v535_v57  ;;  %542 = vadd.xlane.f32.xlu0 %v541_v59 }
 0x102   :  { %v538_v61 = vsel %vm124_vm0, %v166_v54, 0.0  ;;  %v544_v62 = vsel %vm124_vm0, %v288_v60, 0.0 }
 0x105   :  { %539 = vadd.xlane.f32.xlu1 %v538_v61 }
 0x109   :  { %545 = vadd.xlane.f32.xlu1 %v544_v62 }
 0x125   :  { %v406_v63 = vpop.f32.mrb[4].mxu0  ;;  %v528_v1 = vpop.f32.mrb[4].mxu1 }
 0x126   :  { %v407_v0 = vadd.f32 %v406_v63, %v48_v45  ;;  %v408_v2 = vpop.f32.mrb[5].mxu0  ;;  %v530_v3 = vpop.f32.mrb[5].mxu1  ;;  %v529_v5 = vadd.f32 %v528_v1, %v48_v45 }
 0x127   :  { %v409_v4 = vpop.f32.mrb[6].mxu0  ;;  %v531_v6 = vpop.f32.mrb[6].mxu1 }
 0x128   :  { %v411_v7 = vpop.f32.mrb[7].mxu0  ;;  %v549_v8 = vsel %vm124_vm0, %v407_v0, 0.0  ;;  %v533_v9 = vpop.f32.mrb[7].mxu1  ;;  %v410_v10 = vadd.f32 %v409_v4, %v53_v47  ;;  %v557_v11 = vsel %vm124_vm0, %v529_v5, 0.0  ;;  %v532_v12 = vadd.f32 %v531_v6, %v53_v47 }
 0x129   :  { %550 = vadd.xlane.f32.xlu1 %v549_v8  ;;  %v617_v9 = vld [vmem:[%s1138_s3 + $0x8] sm:$0xff] }
 0x12a   :  { %v552_v13 = vsel %vm124_vm0, %v410_v10, 0.0  ;;  %v560_v14 = vsel %vm124_vm0, %v532_v12, 0.0 }
 0x12d   :  { %558 = vadd.xlane.f32.xlu1 %v557_v11 }
 0x131   :  { %553 = vadd.xlane.f32.xlu1 %v552_v13 }
 0x135   :  { %561 = vadd.xlane.f32.xlu1 %v560_v14 }
 0x18e   :  { %v537_v15 = vpop.xlane.xlu1 %536  ;;  %v543_v18 = vpop.xlane.xlu0 %542 }
 0x18f   :  { %v547_v20 = vadd.f32 %v543_v18, %v537_v15  ;;  %v624_v15 = vld [vmem:[%s1139_s4] sm:$0xff] }
 0x192   :  { %v540_v16 = vpop.xlane.xlu1 %539 }
 0x196   :  { %v546_v17 = vpop.xlane.xlu1 %545 }
 0x197   :  { %v548_v26 = vadd.f32 %v546_v17, %v540_v16  ;;  %v625_v16 = vld [vmem:[%s1139_s4 + $0x8] sm:$0xff] }
 0x1b6   :  { %v551_v19 = vpop.xlane.xlu1 %550 }
 0x1b7   :  { %v555_v21 = vadd.f32 %v551_v19, %v547_v20 }
 0x1ba   :  { %v559_v22 = vpop.xlane.xlu1 %558 }
 0x1bb   :  { %v563_v23 = vadd.f32 %v559_v22, %v555_v21 }
 0x1bd   :  { %v566_v24 = vmul.f32 0.0078125, %v563_v23 }
 0x1be   :  { %v554_v25 = vpop.xlane.xlu1 %553 }
 0x1bf   :  { %v1074_v27 = vsub.f32 %v163_v48, %v566_v24  ;;  %v1076_v28 = vsub.f32 %v285_v51, %v566_v24  ;;  %v556_v29 = vadd.f32 %v554_v25, %v548_v26  ;;  %v1080_v32 = vsub.f32 %v407_v0, %v566_v24 }
 0x1c0   :  { %v602_v44 = vsub.f32 %v529_v5, %v566_v24 }
 0x1c1   :  { %v570_v30 = vmul.f32 %v1074_v27, %v1074_v27  ;;  %v580_v35 = vmul.f32 %v1076_v28, %v1076_v28  ;;  %v592_v37 = vmul.f32 %v1080_v32, %v1080_v32 }
 0x1c2   :  { %v562_v31 = vpop.xlane.xlu1 %561  ;;  %v604_v52 = vmul.f32 %v602_v44, %v602_v44 }
 0x1c3   :  { %v564_v33 = vadd.f32 %v562_v31, %v556_v29  ;;  %v572_v34 = vsel %vm124_vm0, %v570_v30, 0.0  ;;  %v582_v38 = vsel %vm124_vm0, %v580_v35, 0.0  ;;  %v594_v43 = vsel %vm124_vm0, %v592_v37, 0.0 }
 0x1c4   :  { %573 = vadd.xlane.f32.xlu1 %v572_v34 }
 0x1c5   :  { %v567_v36 = vmul.f32 0.0078125, %v564_v33 }
 0x1c7   :  { %v1088_v39 = vsub.f32 %v288_v60, %v567_v36  ;;  %v1090_v40 = vsub.f32 %v410_v10, %v567_v36  ;;  %v1092_v41 = vsub.f32 %v166_v54, %v567_v36  ;;  %v1102_v48 = vsub.f32 %v532_v12, %v567_v36  ;;  %v616_v10 = vld [vmem:[%s1138_s3] sm:$0xff] }
 0x1c8   :  { %583 = vadd.xlane.f32.xlu1 %v582_v38  ;;  %v606_v54 = vsel %vm124_vm0, %v604_v52, 0.0 }
 0x1c9   :  { %v581_v42 = vmul.f32 %v1088_v39, %v1088_v39  ;;  %v593_v46 = vmul.f32 %v1090_v40, %v1090_v40  ;;  %v571_v47 = vmul.f32 %v1092_v41, %v1092_v41  ;;  %v605_v51 = vmul.f32 %v1102_v48, %v1102_v48 }
 0x1cb   :  { %v585_v45 = vsel %vm124_vm0, %v581_v42, 0.0  ;;  %v597_v49 = vsel %vm124_vm0, %v593_v46, 0.0  ;;  %v575_v50 = vsel %vm124_vm0, %v571_v47, 0.0  ;;  %v609_v53 = vsel %vm124_vm0, %v605_v51, 0.0 }
 0x1cc   :  { %595 = vadd.xlane.f32.xlu1 %v594_v43  ;;  %586 = vadd.xlane.f32.xlu0 %v585_v45 }
 0x1d0   :  { %598 = vadd.xlane.f32.xlu0 %v597_v49  ;;  %576 = vadd.xlane.f32.xlu1 %v575_v50 }
 0x1d4   :  { %610 = vadd.xlane.f32.xlu0 %v609_v53  ;;  %607 = vadd.xlane.f32.xlu1 %v606_v54 }
 0x251   :  { %v574_v55 = vpop.xlane.xlu1 %573 }
 0x255   :  { %v584_v56 = vpop.xlane.xlu1 %583 }
 0x256   :  { %v588_v61 = vadd.f32 %v584_v56, %v574_v55 }
 0x259   :  { %v587_v57 = vpop.xlane.xlu0 %586  ;;  %v596_v58 = vpop.xlane.xlu1 %595 }
 0x25a   :  { %v600_v63 = vadd.f32 %v596_v58, %v588_v61 }
 0x25d   :  { %v599_v59 = vpop.xlane.xlu0 %598  ;;  %v577_v60 = vpop.xlane.xlu1 %576 }
 0x25e   :  { %v589_v62 = vadd.f32 %v587_v57, %v577_v60 }
 0x260   :  { %v601_v0 = vadd.f32 %v599_v59, %v589_v62 }
 0x261   :  { %v611_v1 = vpop.xlane.xlu0 %610  ;;  %v608_v2 = vpop.xlane.xlu1 %607 }
 0x262   :  { %v613_v3 = vadd.f32 %v611_v1, %v601_v0  ;;  %v612_v4 = vadd.f32 %v608_v2, %v600_v63 }
 0x264   :  { %v615_v5 = vmul.f32 0.0078125, %v613_v3  ;;  %v614_v6 = vmul.f32 0.0078125, %v612_v4 }
 0x266   :  { %v619_v7 = vadd.f32 1e-05, %v615_v5  ;;  %v618_v8 = vadd.f32 1e-05, %v614_v6 }
 0x268   :  { %847 = vrsqrt.f32 %v619_v7 }
 0x269   :  { %849 = vrsqrt.f32 %v618_v8 }
 0x272   :  { %v848_v11 = vpop.eup %847 }
 0x273   :  { %v850_v12 = vpop.eup %849  ;;  %v623_v13 = vmul.f32 %v848_v11, %v617_v9 }
 0x274   :  { %v622_v14 = vmul.f32 %v850_v12, %v616_v10 }
 0x275   :  { %633 = vperm.xlu0 %802, %v623_v13  }
 0x276   :  { %628 = vperm.xlu1 %803, %v622_v14  }
 0x27a   :  { %640 = vperm.xlu1 %803, %v624_v15  }
 0x27e   :  { %645 = vperm.xlu1 %803, %v625_v16  }
 0x2f4   :  { %v634_v18 = vpop.permute.xlu0 %633 }
 0x2f5   :  { %v629_v17 = vpop.permute.xlu1 %628  ;;  %v637_v30 = vmul.f32 %v634_v18, %v1092_v41  ;;  %v653_v31 = vmul.f32 %v634_v18, %v1088_v39 }
 0x2f6   :  { %v636_v19 = vmul.f32 %v629_v17, %v1074_v27  ;;  %v652_v20 = vmul.f32 %v629_v17, %v1076_v28  ;;  %v658_v21 = vmul.f32 %v629_v17, %v1080_v32  ;;  %v664_v22 = vmul.f32 %v629_v17, %v602_v44 }
 0x2f7   :  { %v659_v27 = vmul.f32 %v634_v18, %v1090_v40  ;;  %v665_v28 = vmul.f32 %v634_v18, %v1102_v48 }
 0x2f9   :  { %v641_v23 = vpop.permute.xlu1 %640 }
 0x2fa   :  { %v648_v24 = vadd.f32 %v641_v23, %v636_v19  ;;  %v654_v25 = vadd.f32 %v652_v20, %v641_v23  ;;  %v660_v26 = vadd.f32 %v658_v21, %v641_v23  ;;  %v666_v29 = vadd.f32 %v664_v22, %v641_v23 }
 0x2fc   :  { %v650_v33 = vmax.f32 %v648_v24, 0.0  ;;  %v656_v34 = vmax.f32 %v654_v25, 0.0  ;;  %v662_v35 = vmax.f32 %v660_v26, 0.0  ;;  %v668_v36 = vmax.f32 %v666_v29, 0.0 }
 0x2fd   :  { %v646_v37 = vpop.permute.xlu1 %645 }
 0x2fe   :  { %v670_v32 = vmax.f32 %v650_v33, %v656_v34  ;;  %v672_v38 = vmax.f32 %v662_v35, %v668_v36  ;;  %v649_v42 = vadd.f32 %v646_v37, %v637_v30  ;;  %v655_v43 = vadd.f32 %v653_v31, %v646_v37 }
 0x2ff   :  { %v661_v44 = vadd.f32 %v659_v27, %v646_v37  ;;  %v667_v45 = vadd.f32 %v665_v28, %v646_v37 }
 0x300   :  { %v674_v46 = vmax.f32 %v670_v32, %v672_v38  ;;  %v651_v47 = vmax.f32 %v649_v42, 0.0  ;;  %v657_v41 = vmax.f32 %v655_v43, 0.0 }
 0x301   :  { %v663_v39 = vmax.f32 %v661_v44, 0.0  ;;  %v669_v49 = vmax.f32 %v667_v45, 0.0 }
 0x302   :  { %v799_v50 = vpack.c.bf16 %v674_v46, %v674_v46  ;;  %v671_v51 = vmax.f32 %v651_v47, %v657_v41 }
 0x303   :  { %v673_v52 = vmax.f32 %v663_v39, %v669_v49 }
 0x304   :  { %685 = vst.msk [vmem:[%s1140_s5] sm:$0xf] %vm684_vm1, %v799_v50 }
 0x305   :  { %v675_v40 = vmax.f32 %v671_v51, %v673_v52 }
 0x307   :  { %v800_v48 = vpack.c.bf16 %v675_v40, %v675_v40 }
 0x309   :  { %686 = vst.msk [vmem:[%s1140_s5 + $0x4] sm:$0xf] %vm684_vm1, %v800_v48 }

// kernel: net_forward.5
= control target key start
LH: loop header
LB: loop body
LE: loop exit
PB: predicated region body
PF: predicated region fallthrough
CT: control target
= control target key end

     0   :  { %v92_v8 = vlaneseq  ;;  %v726_v15 = vmov 1966171168   ;;  %s936_s0 = inlined_call_operand.vmem [shape: bf16[2,256], index: 0, kind: input, shape index: {}]   ;;  %s937_s1 = inlined_call_operand.vmem [shape: bf16[256,120], index: 1, kind: input, shape index: {}]   ;;  %s938_s2 = inlined_call_operand.vmem [shape: f32[1,120], index: 2, kind: input, shape index: {}]   ;;  %s939_s3 = inlined_call_operand.vmem [shape: f32[1,120], index: 3, kind: input, shape index: {}]   ;;  %s940_s4 = inlined_call_operand.vmem [shape: f32[1,120], index: 4, kind: input, shape index: {}]   ;;  %s941_s5 = inlined_call_operand.vmem [shape: bf16[120,84], index: 5, kind: input, shape index: {}]   ;;  %s942_s6 = inlined_call_operand.vmem [shape: f32[1,84], index: 6, kind: input, shape index: {}]   ;;  %s943_s7 = inlined_call_operand.vmem [shape: f32[1,84], index: 7, kind: input, shape index: {}]   ;;  %s944_s8 = inlined_call_operand.vmem [shape: f32[1,84], index: 8, kind: input, shape index: {}]   ;;  %s945_s9 = inlined_call_operand.vmem [shape: bf16[84,10], index: 9, kind: input, shape index: {}]   ;;  %s946_s10 = inlined_call_operand.vmem [shape: f32[1,10], index: 10, kind: input, shape index: {}]   ;;  %s947_s11 = inlined_call_operand.hbm [shape: f32[2,10], index: 11, kind: output, shape index: {}]  }
   0x1   :  { %v668_v0 = vld [vmem:[%s937_s1 + $0x40] sm:$0xff]   ;;  %v670_v2 = vld [vmem:[%s937_s1 + $0x48] sm:$0xff]   ;;  %v672_v4 = vld [vmem:[%s937_s1 + $0x50] sm:$0xff]   ;;  %v90_v16 = vunpack.c.l.s4 %v726_v15 }
   0x2   :  { %v669_v1 = vld [vmem:[%s937_s1] sm:$0xff]   ;;  %590 = vmatprep.subr.bf16.mxu0 %v668_v0  ;;  %v671_v3 = vld [vmem:[%s937_s1 + $0x8] sm:$0xff]   ;;  %v673_v5 = vld [vmem:[%s937_s1 + $0x10] sm:$0xff]   ;;  %v823_v12 = vshrl.u32 %v92_v8, 7 }
   0x3   :  { %591 = vmatpush3.bf16.msra.mxu0 %v669_v1  ;;  %v674_v6 = vld [vmem:[%s937_s1 + $0x58] sm:$0xff]   ;;  %v676_v9 = vld [vmem:[%s937_s1 + $0x60] sm:$0xff]   ;;  %v678_v11 = vld [vmem:[%s937_s1 + $0x68] sm:$0xff]   ;;  %v91_v19 = vunpack.c.0.s8 %v90_v16 }
   0x4   :  { %592 = vmatprep.subr.bf16.mxu0 %v670_v2  ;;  %v675_v7 = vld [vmem:[%s937_s1 + $0x18] sm:$0xff]   ;;  %v677_v10 = vld [vmem:[%s937_s1 + $0x20] sm:$0xff]   ;;  %v679_v14 = vld [vmem:[%s937_s1 + $0x28] sm:$0xff]  }
   0x5   :  { %v553_v13 = vld.sshfl [vmem:[%s936_s0] sm:$0x11 pattern:$0x75316420]  ;;  %v680_v17 = vld [vmem:[%s937_s1 + $0x70] sm:$0xff]   ;;  %v94_v21 = vsub.s32 %v91_v19, %v823_v12  ;;  %v682_v22 = vld [vmem:[%s937_s1 + $0x78] sm:$0xff]  }
   0x6   :  { %v88_v18 = vcombine.high %v553_v13, %v553_v13  ;;  %v681_v20 = vld [vmem:[%s937_s1 + $0x30] sm:$0xff]  }
   0x7   :  { %593 = vmatpush3.bf16.msra.mxu0 %v671_v3 }
   0x8   :  { %594 = vmatprep.subr.bf16.mxu0 %v672_v4  ;;  %v102_v23 = vrot.slane %v88_v18, %v94_v21 }
   0xa   :  { %233 = vmatprep.mubr.bf16.mxu0 %v102_v23 }
   0xb   :  { %595 = vmatpush3.bf16.msra.mxu0 %v673_v5 }
   0xc   :  { %596 = vmatprep.subr.bf16.mxu0 %v674_v6 }
   0xf   :  { %597 = vmatpush3.bf16.msra.mxu0 %v675_v7 }
  0x10   :  { %598 = vmatprep.subr.bf16.mxu0 %v676_v9 }
  0x13   :  { %599 = vmatpush3.bf16.msra.mxu0 %v677_v10 }
  0x14   :  { %600 = vmatprep.subr.bf16.mxu0 %v678_v11 }
  0x17   :  { %601 = vmatpush3.bf16.msra.mxu0 %v679_v14 }
  0x18   :  { %602 = vmatprep.subr.bf16.mxu0 %v680_v17 }
  0x19   :  { %16 = vsyncpa [#allocation3], 0  ;;  %v683_v24 = vld [vmem:[%s937_s1 + $0x38] sm:$0xff]   ;;  %v95_v25 = vrot.slane %v553_v13, %v94_v21  ;;  %v684_v26 = vld [vmem:[%s941_s5] sm:$0xff]   ;;  %v727_v27 = vmov 0.0   ;;  %vm353_vm0 = vcmask 1043456  }
  0x1a   :  { %628 = vmatprep.subr.bf16.mxu1 %v727_v27  ;;  %v685_v28 = vld [vmem:[%s941_s5 + $0x8] sm:$0xff]   ;;  %v686_v29 = vld [vmem:[%s941_s5 + $0x10] sm:$0xff]   ;;  %v687_v30 = vld [vmem:[%s941_s5 + $0x18] sm:$0xff]   ;;  %vm728_vm1 = vmmov 0   ;;  %vm243_vm2 = vcmask 975872   ;;  %v269_v63 = vsub.s32 0, %v823_v12 }
  0x1b   :  { %603 = vmatpush3.bf16.msra.mxu0 %v681_v20  ;;  %629 = vmatpush3.bf16.msra.mxu1 %v684_v26  ;;  %v688_v31 = vld [vmem:[%s941_s5 + $0x20] sm:$0xff]   ;;  %v689_v32 = vld [vmem:[%s941_s5 + $0x28] sm:$0xff]   ;;  %v690_v33 = vld [vmem:[%s941_s5 + $0x30] sm:$0xff]   ;;  %vm349_vm3 = vcmask 982016   ;;  %vm492_vm4 = vcmask 1041408   ;;  %vm399_vm5 = vcmask 680960  }
  0x1c   :  { %604 = vmatprep.subr.bf16.mxu0 %v682_v22  ;;  %630 = vmatprep.subr.bf16.mxu1 %v727_v27  ;;  %v691_v34 = vld [vmem:[%s941_s5 + $0x38] ss:$0 sps:$4 sm:$0xff]   ;;  %v552_v37 = vld [vmem:[%s938_s2] ss:$0 sm:$0xff]  ;;  %v693_v9 = vld [vmem:[%s945_s9 + $0x8] sm:$0xff]   ;;  %vm488_vm6 = vcmask 687104  }
  0x1d   :  { %644 = vmatprep.mubr.msk.bf16.mxu1 %vm728_vm1, %v727_v27  ;;  %v355_v35 = vsel %vm353_vm0, %v691_v34, 0  ;;  %v241_v62 = vld [vmem:[%s939_s3] sm:$0x1]  ;;  %v694_v10 = vld [vmem:[%s945_s9 + $0x10] sm:$0xff]   ;;  %v695_v11 = vld [vmem:[%s945_s9 + $0x18] sm:$0xff]   ;;  %s729_s26 = smov [#allocation2]  }
  0x1e   :  { %v570_v3 = vld [vmem:[%s940_s4] ss:$0 sm:$0xff]  ;;  %v697_v13 = vld [vmem:[%s945_s9 + $0x28] ss:$0 sps:$4 sm:$0x33]   ;;  %s544_s27 = sshll.u32 %s729_s26, 4  ;;  %s545_s27 = int_to_ptr.vmem [resolvable:$true] %s544_s27 }
  0x1f   :  { %605 = vmatpush3.bf16.msra.mxu0 %v683_v24  ;;  %631 = vmatpush3.bf16.msra.mxu1 %v685_v28  ;;  %v692_v8 = vld [vmem:[%s945_s9] sm:$0xff]   ;;  %v494_v14 = vsel %vm492_vm4, %v697_v13, 0  ;;  %vm536_vm7 = vcmask 74752   ;;  %p707_p1 = scmp.lt.s32.totalorder %s545_s27, %s545_s27 }
  0x20   :  { %648 = vmatprep.subr.bf16.mxu0 %v727_v27  ;;  %632 = vmatprep.subr.bf16.mxu1 %v727_v27  ;;  %v696_v12 = vld [vmem:[%s945_s9 + $0x20] sm:$0xff]  }
  0x21   :  { %v571_v15 = vld [vmem:[%s942_s6] ss:$0 sm:$0xff] }
  0x22   :  { %234 = vmatmul.mubr.bf16.vlgmr.msra.gmra.mrb[0].mxu0 %v95_v25 }
  0x23   :  { %633 = vmatpush3.bf16.msra.mxu1 %v686_v29  ;;  %660 = vmatprep.mubr.msk.bf16.mxu0 %vm728_vm1, %v727_v27 }
  0x24   :  { %634 = vmatprep.subr.bf16.mxu1 %v727_v27  ;;  %649 = vmatpush3.bf16.msra.mxu0 %v692_v8 }
  0x25   :  { %650 = vmatprep.subr.bf16.mxu0 %v727_v27 }
  0x27   :  { %635 = vmatpush3.bf16.msra.mxu1 %v687_v30 }
  0x28   :  { %636 = vmatprep.subr.bf16.mxu1 %v727_v27  ;;  %651 = vmatpush3.bf16.msra.mxu0 %v693_v9 }
  0x29   :  { %652 = vmatprep.subr.bf16.mxu0 %v727_v27 }
  0x2b   :  { %637 = vmatpush3.bf16.msra.mxu1 %v688_v31 }
  0x2c   :  { %638 = vmatprep.subr.bf16.mxu1 %v727_v27  ;;  %653 = vmatpush3.bf16.msra.mxu0 %v694_v10 }
  0x2d   :  { %654 = vmatprep.subr.bf16.mxu0 %v727_v27 }
  0x2f   :  { %639 = vmatpush3.bf16.msra.mxu1 %v689_v32 }
  0x30   :  { %640 = vmatprep.subr.bf16.mxu1 %v727_v27  ;;  %655 = vmatpush3.bf16.msra.mxu0 %v695_v11 }
  0x31   :  { %656 = vmatprep.subr.bf16.mxu0 %v727_v27 }
  0x33   :  { %641 = vmatpush3.bf16.msra.mxu1 %v690_v33 }
  0x34   :  { %642 = vmatprep.subr.bf16.mxu1 %v727_v27  ;;  %657 = vmatpush3.bf16.msra.mxu0 %v696_v12 }
  0x35   :  { %658 = vmatprep.subr.bf16.mxu0 %v727_v27 }
  0x37   :  { %643 = vmatpush3.bf16.msra.mxu1 %v355_v35 }
  0x38   :  { %659 = vmatpush3.bf16.msra.mxu0 %v494_v14 }
  0xf5   :  { %v606_v36 = vpop.f32.mrb[0].mxu0 }
  0xf6   :  { %v607_v38 = vpop.f32.mrb[1].mxu0 }
  0xf7   :  { %v608_v39 = vadd.f32 %v607_v38, %v606_v36  ;;  %v609_v40 = vpop.f32.mrb[2].mxu0 }
  0xf8   :  { %v610_v41 = vpop.f32.mrb[3].mxu0  ;;  %v397_v40 = vld [vmem:[%s943_s7] sm:$0x1]  ;;  %s702_s7 = scalar_lea.vmem %s545_s27, 32 }
  0xf9   :  { %v236_v42 = vadd.f32 %v608_v39, %v552_v37  ;;  %p703_p0 = scmp.ne.s32.totalorder %s545_s27, %s702_s7  ;;  %p708_p2 = scmp.lt.s32.totalorder %s702_s7, %s702_s7 }
  0xfb   :  { %v244_v43 = vsel %vm243_vm2, %v236_v42, 0.0  ;;  %p709_p3 = por %p708_p2, %p707_p1 }
  0xfc   :  { %v245_v44 = vrot.slane %v244_v43, 4 }
  0xfd   :  { %p710_p4 = pnand %p709_p3, %p703_p0 }
  0xfe   :  { %v246_v45 = vadd.f32 %v245_v44, %v244_v43  ;;  %v581_v44 = vld [vmem:[%s944_s8] ss:$0 sm:$0xff] }
 0x100   :  { %v247_v46 = vrot.slane %v246_v45, 2 }
 0x102   :  { %v248_v47 = vadd.f32 %v247_v46, %v246_v45 }
 0x104   :  { %v249_v48 = vrot.slane %v248_v47, 1 }
 0x106   :  { %v250_v49 = vadd.f32 %v249_v48, %v248_v47 }
 0x108   :  { %v252_v50 = vmul.f32 0.5, %v250_v49  ;;  %v582_v49 = vld [vmem:[%s946_s10] ss:$0 sm:$0xff] }
 0x10a   :  { %v253_v51 = vsub.f32 %v236_v42, %v252_v50 }
 0x10c   :  { %v254_v52 = vmul.f32 %v253_v51, %v253_v51 }
 0x10e   :  { %v255_v53 = vsel %vm243_vm2, %v254_v52, 0.0 }
 0x10f   :  { %v256_v54 = vrot.slane %v255_v53, 4 }
 0x111   :  { %v257_v55 = vadd.f32 %v256_v54, %v255_v53 }
 0x113   :  { %v258_v56 = vrot.slane %v257_v55, 2 }
 0x115   :  { %v259_v57 = vadd.f32 %v258_v56, %v257_v55 }
 0x117   :  { %v260_v58 = vrot.slane %v259_v57, 1 }
 0x119   :  { %v261_v59 = vadd.f32 %v260_v58, %v259_v57 }
 0x11b   :  { %v262_v60 = vmul.f32 0.5, %v261_v59 }
 0x11d   :  { %v263_v61 = vadd.f32 1e-05, %v262_v60 }
 0x11f   :  { %698 = vrsqrt.f32 %v263_v61 }
 0x129   :  { %v699_v0 = vpop.eup %698 }
 0x12a   :  { %v265_v1 = vmul.f32 %v699_v0, %v241_v62 }
 0x12c   :  { %v270_v2 = vrot.slane %v265_v1, %v269_v63 }
 0x12e   :  { %v272_v4 = vmul.f32 %v270_v2, %v253_v51 }
 0x130   :  { %v279_v5 = vadd.f32 %v570_v3, %v272_v4 }
 0x132   :  { %v280_v6 = vmax.f32 %v279_v5, 0.0 }
 0x134   :  { %v281_v7 = vpack.c.bf16 %v280_v6, %v280_v6 }
 0x136   :  { %645 = vmatmul.mubr.msk.bf16.vlgmr.msra.gmra.mrb[0].mxu1 %vm349_vm3, %v281_v7 }
 0x209   :  { %v391_v16 = vpop.f32.mrb[0].mxu1 }
 0x20a   :  { %v392_v17 = vadd.f32 %v571_v15, %v391_v16  ;;  %v646_v18 = vpop.f32.mrb[1].mxu1 }
 0x20b   :  { %v394_v19 = vpop.f32.mrb[2].mxu1 }
 0x20c   :  { %v400_v20 = vsel %vm399_vm5, %v392_v17, 0.0  ;;  %v647_v21 = vpop.f32.mrb[3].mxu1 }
 0x20d   :  { %v401_v22 = vrot.slane %v400_v20, 4 }
 0x20f   :  { %v402_v23 = vadd.f32 %v401_v22, %v400_v20 }
 0x211   :  { %v403_v24 = vrot.slane %v402_v23, 2 }
 0x213   :  { %v404_v25 = vadd.f32 %v403_v24, %v402_v23 }
 0x215   :  { %v405_v26 = vrot.slane %v404_v25, 1 }
 0x217   :  { %v406_v27 = vadd.f32 %v405_v26, %v404_v25 }
 0x219   :  { %v407_v28 = vmul.f32 0.5, %v406_v27 }
 0x21b   :  { %v408_v29 = vsub.f32 %v392_v17, %v407_v28 }
 0x21d   :  { %v409_v30 = vmul.f32 %v408_v29, %v408_v29 }
 0x21f   :  { %v410_v31 = vsel %vm399_vm5, %v409_v30, 0.0 }
 0x220   :  { %v411_v32 = vrot.slane %v410_v31, 4 }
 0x222   :  { %v412_v33 = vadd.f32 %v411_v32, %v410_v31 }
 0x224   :  { %v413_v34 = vrot.slane %v412_v33, 2 }
 0x226   :  { %v414_v35 = vadd.f32 %v413_v34, %v412_v33 }
 0x228   :  { %v415_v36 = vrot.slane %v414_v35, 1 }
 0x22a   :  { %v416_v37 = vadd.f32 %v415_v36, %v414_v35 }
 0x22c   :  { %v417_v38 = vmul.f32 0.5, %v416_v37 }
 0x22e   :  { %v418_v39 = vadd.f32 1e-05, %v417_v38 }
 0x230   :  { %700 = vrsqrt.f32 %v418_v39 }
 0x23a   :  { %v701_v41 = vpop.eup %700 }
 0x23b   :  { %v420_v42 = vmul.f32 %v701_v41, %v397_v40 }
 0x23d   :  { %v425_v43 = vrot.slane %v420_v42, %v269_v63 }
 0x23f   :  { %v427_v45 = vmul.f32 %v425_v43, %v408_v29 }
 0x241   :  { %v434_v46 = vadd.f32 %v581_v44, %v427_v45 }
 0x243   :  { %v435_v47 = vmax.f32 %v434_v46, 0.0 }
 0x245   :  { %v436_v48 = vpack.c.bf16 %v435_v47, %v435_v47 }
 0x247   :  { %661 = vmatmul.mubr.msk.bf16.vlgmr.msra.gmra.mrb[4].mxu0 %vm488_vm6, %v436_v48 }
 0x31a   :  { %v530_v50 = vpop.f32.mrb[4].mxu0 }
 0x31b   :  { %v531_v51 = vadd.f32 %v582_v49, %v530_v50  ;;  %v662_v52 = vpop.f32.mrb[5].mxu0 }
 0x31c   :  { %v533_v53 = vpop.f32.mrb[6].mxu0 }
 0x31d   :  { %v663_v54 = vpop.f32.mrb[7].mxu0  ;;  %537 = vst.msk [vmem:[#allocation2] sm:$0x3] %vm536_vm7, %v531_v51 }
 0x31e   :  { %713 = shalt.err (!%p710_p4)
}
 0x31f   :  { %s714_s10 = scalar_lea.hbm %s947_s11, 32 }
 0x320   :  { %p715_p5 = scmp.ne.s32.totalorder %s947_s11, %s714_s10  ;;  %p718_p6 = scmp.lt.u32.totalorder %s714_s10, %s947_s11 }
 0x322   :  { %p720_p7 = pnand %p718_p6, %p715_p5 }
 0x324   :  { %723 = shalt.err (!%p720_p7)
}
 0x325   :  { %547 = dma.vmem_to_hbm [thread:$0]  %s545_s27, 32, %s947_s11, [#allocation3]  }
 0x326   :  { %724 = dma.done.wait [#allocation3], 32  }
 0x327   :  { %725 = vsyncadd [#allocation3], 4294967264 }
 0x328   :  { %551 = vsyncpa [#allocation3], 1 }

</bundles_post_ra>
